<compile_context>
chip_gen: v5e
topology: v5e:2x2
jax: 0.10.0
libtpu: 0.0.40
codegen_flags: <defaults>
</compile_context>

<pallas_src>
import functools

import jax
import jax.numpy as jnp
from jax import lax
from jax.experimental import pallas as pl
from jax.experimental.pallas import tpu as pltpu


def _round_up(x, m):
    return (x + m - 1) // m * m


def basic_block_kernel(x_ref, w1_ref, b1_ref, w2_ref, b2_ref, mask_ref, anc_ref,
                       o_ref, *, Wp, SLABW):
    # x_ref   : (CinP, BUF)      bf16  zero-padded input, batch+spatial flattened on lanes
    # w1_ref  : (ChidP, 9*CinP)  bf16  conv1 weights, columns ordered (ky, kx, cin)
    # b1_ref  : (ChidP, 1)       f32
    # w2_ref  : (CoutP, 9*ChidP) bf16  conv2 weights, columns ordered (ky, kx, chid)
    # b2_ref  : (CoutP, 1)       f32
    # mask_ref: (1, SLABW)       f32   1.0 at valid (in-image, non-halo, non-tail) positions
    # anc_ref : (1, NOUTP)       i32   flat slab index of each 2x2-pool anchor (-1 = unused)
    # o_ref   : (CoutP, NOUTP)   f32   pooled output, NOUTP multiple of 128 (lane-dense)
    f32 = jnp.float32
    bf16 = jnp.bfloat16
    offs = [ky * Wp + kx for ky in range(3) for kx in range(3)]

    x = x_ref[...]                                                    # (CinP, BUF) bf16

    # ---- conv1: bf16 im2col patch matrix -> single MXU matmul (f32 accumulate) ----
    p1 = jnp.concatenate([x[:, s:s + SLABW] for s in offs], axis=0)   # (9*CinP, SLABW) bf16
    a1 = jnp.dot(w1_ref[...], p1, preferred_element_type=f32)         # (ChidP, SLABW) f32
    h = jnp.maximum(a1 + b1_ref[...], 0.0) * mask_ref[...]            # ReLU + zero halo/junk
    hb = h.astype(bf16)                                               # bf16 before the concats

    # ---- recreate the 1-pixel halo for conv2 as a value (no scratch round trip) ----
    chid = hb.shape[0]
    zpad = jnp.zeros((chid, Wp + 1), bf16)
    hpad = jnp.concatenate([zpad, hb, zpad], axis=1)                  # (ChidP, SLABW + 2*Wp + 2)

    # ---- conv2: same bf16 im2col single matmul ----
    p2 = jnp.concatenate([hpad[:, s:s + SLABW] for s in offs], axis=0)  # (9*ChidP, SLABW) bf16
    a2 = jnp.dot(w2_ref[...], p2, preferred_element_type=f32)         # (CoutP, SLABW) f32
    y = jnp.maximum(a2 + b2_ref[...], 0.0)

    # ---- 2x2 stride-2 max pool: window max everywhere, then exact anchor gather ----
    cout = y.shape[0]
    padw = _round_up(Wp + 2, 128)                                     # shift headroom, lane-tile
    ypad = jnp.concatenate([y, jnp.zeros((cout, padw), f32)], axis=1)
    vm = jnp.maximum(jnp.maximum(ypad[:, 0:SLABW], ypad[:, 1:SLABW + 1]),
                     jnp.maximum(ypad[:, Wp:Wp + SLABW], ypad[:, Wp + 1:Wp + SLABW + 1]))

    # 0/1 selection matrix generated in-kernel (no HBM traffic), bf16 -> single-pass MXU gather.
    nout_p = o_ref.shape[1]
    r = lax.broadcasted_iota(jnp.int32, (SLABW, nout_p), 0)
    sel = jnp.where(r == anc_ref[...], 1.0, 0.0).astype(bf16)         # (SLABW, NOUTP)
    o_ref[...] = jnp.dot(vm.astype(bf16), sel, preferred_element_type=f32)


def basic_block(x_nchw, w1_oihw, b1, w2_oihw, b2):
    """Forward pass matching the PyTorch BasicBlock. Input/output are NCHW."""
    N, Cin, H, W = x_nchw.shape
    Chid = w1_oihw.shape[0]
    Cout = w2_oihw.shape[0]
    assert H % 2 == 0 and W % 2 == 0
    Hp, Wp = H + 2, W + 2
    P = Hp * Wp                           # flat padded size of one image (per channel)
    Ho, Wo = H // 2, W // 2
    NOUT = N * Ho * Wo
    NOUTP = _round_up(NOUT, 128)

    # Flat "slab" of conv-output positions covering the whole batch; lane-tile padded.
    SLAB = (N - 1) * P + H * Wp
    SLABW = _round_up(SLAB, 128)
    BUF = _round_up(SLABW + 2 * Wp + 2, 128)      # flat input length incl. shift headroom
    assert N * P <= BUF

    # Every pool anchor's whole 2x2 window stays inside the valid slab region (even H, W).
    max_anchor = (N - 1) * P + (H - 2) * Wp + (W - 2)
    assert max_anchor + Wp + 1 < SLAB

    # Pad channel counts to the 8-sublane tile so sublane concats / final store are aligned.
    CinP = _round_up(Cin, 8)
    ChidP = _round_up(Chid, 8)
    CoutP = _round_up(Cout, 8)

    f32 = jnp.float32
    bf16 = jnp.bfloat16

    # ---- input: NCHW -> (CinP, N*Hp*Wp) flat, zero-padded, shipped as bf16 ----
    xpad = jnp.pad(x_nchw.astype(f32), ((0, 0), (0, CinP - Cin), (1, 1), (1, 1)))
    xflat = jnp.transpose(xpad, (1, 0, 2, 3)).reshape(CinP, N * P)
    xflat = jnp.pad(xflat, ((0, 0), (0, BUF - N * P))).astype(bf16)

    # ---- weights: OIHW -> (CoutP, 9*CinP), columns ordered (ky, kx, cin); bf16 for the MXU ----
    def conv_mat(w, cout_pad, cin_pad):
        co, ci = w.shape[0], w.shape[1]
        wp = jnp.pad(w.astype(f32), ((0, cout_pad - co), (0, cin_pad - ci), (0, 0), (0, 0)))
        return (jnp.transpose(wp, (0, 2, 3, 1))
                .reshape(cout_pad, 9 * cin_pad).astype(bf16))

    w1m = conv_mat(w1_oihw, ChidP, CinP)                 # (ChidP, 9*CinP)
    w2m = conv_mat(w2_oihw, CoutP, ChidP)                # (CoutP, 9*ChidP)
    b1c = jnp.pad(b1.astype(f32), (0, ChidP - Chid)).reshape(ChidP, 1)
    b2c = jnp.pad(b2.astype(f32), (0, CoutP - Cout)).reshape(CoutP, 1)

    # ---- validity mask over the (padded) slab: zero at halo columns / rows / tail pad ----
    gidx = jnp.arange(SLABW)
    loc = gidx % P
    valid = (gidx < SLAB) & ((loc % Wp) < W) & ((loc // Wp) < H)
    mask = valid.astype(f32).reshape(1, SLABW)

    # ---- pool-anchor flat indices (tiny int32 vector; the dense 0/1 matrix is built in-kernel) ----
    j = jnp.arange(NOUTP)
    n_i = j // (Ho * Wo)
    py = (j % (Ho * Wo)) // Wo
    px = j % Wo
    anchors = jnp.where(j < NOUT, n_i * P + (2 * py) * Wp + 2 * px, -1)
    anchors = anchors.astype(jnp.int32).reshape(1, NOUTP)

    kernel = functools.partial(basic_block_kernel, Wp=Wp, SLABW=SLABW)
    out_flat = pl.pallas_call(
        kernel,
        out_shape=jax.ShapeDtypeStruct((CoutP, NOUTP), f32),
        grid=(1,),
        in_specs=[
            pl.BlockSpec((CinP, BUF), lambda i: (0, 0)),
            pl.BlockSpec((ChidP, 9 * CinP), lambda i: (0, 0)),
            pl.BlockSpec((ChidP, 1), lambda i: (0, 0)),
            pl.BlockSpec((CoutP, 9 * ChidP), lambda i: (0, 0)),
            pl.BlockSpec((CoutP, 1), lambda i: (0, 0)),
            pl.BlockSpec((1, SLABW), lambda i: (0, 0)),
            pl.BlockSpec((1, NOUTP), lambda i: (0, 0)),
        ],
        out_specs=pl.BlockSpec((CoutP, NOUTP), lambda i: (0, 0)),
        compiler_params=pltpu.CompilerParams(dimension_semantics=("arbitrary",)),
    )(xflat, w1m, b1c, w2m, b2c, mask, anchors)

    # (CoutP, NOUTP) -> slice real rows/cols -> NCHW
    out = out_flat[:Cout, :NOUT].reshape(Cout, N, Ho, Wo)
    return jnp.transpose(out, (1, 0, 2, 3))


def basic_block_reference(x_nchw, w1_oihw, b1, w2_oihw, b2):
    """Pure-JAX reference (lax.conv / reduce_window) for correctness checking."""
    dn = ("NCHW", "OIHW", "NCHW")
    y = lax.conv_general_dilated(x_nchw, w1_oihw, (1, 1), ((1, 1), (1, 1)),
                                 dimension_numbers=dn)
    y = jnp.maximum(y + b1[None, :, None, None], 0.0)
    y = lax.conv_general_dilated(y, w2_oihw, (1, 1), ((1, 1), (1, 1)),
                                 dimension_numbers=dn)
    y = jnp.maximum(y + b2[None, :, None, None], 0.0)
    y = lax.reduce_window(y, -jnp.inf, lax.max,
                          (1, 1, 2, 2), (1, 1, 2, 2), "VALID")
    return y


if __name__ == "__main__":
    # Small shapes consistent with the module: batch=2, in_channels=4,
    # hidden_dim=8, out_channels=4, spatial 16x16.
    N, Cin, Chid, Cout, H, W = 2, 4, 8, 4, 16, 16

    key = jax.random.PRNGKey(0)
    kx, k1, kb1, k2, kb2 = jax.random.split(key, 5)

    x = jax.random.normal(kx, (N, Cin, H, W), dtype=jnp.float32)
    w1 = jax.random.normal(k1, (Chid, Cin, 3, 3), dtype=jnp.float32) * 0.1
    b1 = jax.random.normal(kb1, (Chid,), dtype=jnp.float32) * 0.1
    w2 = jax.random.normal(k2, (Cout, Chid, 3, 3), dtype=jnp.float32) * 0.1
    b2 = jax.random.normal(kb2, (Cout,), dtype=jnp.float32) * 0.1

    out = jax.block_until_ready(basic_block(x, w1, b1, w2, b2))
    ref = jax.block_until_ready(basic_block_reference(x, w1, b1, w2, b2))

    assert out.shape == (N, Cout, H // 2, W // 2), out.shape
    # bf16 MXU operands with f32 accumulation (plus one bf16 rounding on the pool gather)
    # -> relaxed tolerance vs the f32 reference.
    assert jnp.allclose(out, ref, atol=3e-2, rtol=3e-2), "mismatch vs reference"

    print("KERNEL_OK")
</pallas_src>

<mosaic_0001>
module attributes {stable_mosaic.version = 11 : i64} {
  func.func @basic_block_kernel(%arg0: i32, %arg1: memref<8x768xbf16, #tpu.memory_space<vmem>>, %arg2: memref<8x72xbf16, #tpu.memory_space<vmem>>, %arg3: memref<8x1xf32, #tpu.memory_space<vmem>>, %arg4: memref<8x72xbf16, #tpu.memory_space<vmem>>, %arg5: memref<8x1xf32, #tpu.memory_space<vmem>>, %arg6: memref<1x640xf32, #tpu.memory_space<vmem>>, %arg7: memref<1x128xi32, #tpu.memory_space<vmem>>, %arg8: memref<8x128xf32, #tpu.memory_space<vmem>>) attributes {dimension_semantics = [#tpu.dimension_semantics<arbitrary>], iteration_bounds = array<i64: 1>, scalar_prefetch = 0 : i64, scratch_operands = 0 : i64, tpu.core_type = #tpu.core_type<tc>, window_params = [{pipeline_mode = #tpu.pipeline_mode<synchronous>, transform_indices = @transform_0, window_bounds = array<i64: 8, 768>}, {pipeline_mode = #tpu.pipeline_mode<synchronous>, transform_indices = @transform_1, window_bounds = array<i64: 8, 72>}, {pipeline_mode = #tpu.pipeline_mode<synchronous>, transform_indices = @transform_2, window_bounds = array<i64: 8, 1>}, {pipeline_mode = #tpu.pipeline_mode<synchronous>, transform_indices = @transform_3, window_bounds = array<i64: 8, 72>}, {pipeline_mode = #tpu.pipeline_mode<synchronous>, transform_indices = @transform_4, window_bounds = array<i64: 8, 1>}, {pipeline_mode = #tpu.pipeline_mode<synchronous>, transform_indices = @transform_5, window_bounds = array<i64: 1, 640>}, {pipeline_mode = #tpu.pipeline_mode<synchronous>, transform_indices = @transform_6, window_bounds = array<i64: 1, 128>}, {pipeline_mode = #tpu.pipeline_mode<synchronous>, transform_indices = @transform_7, window_bounds = array<i64: 8, 128>}]} {
    %c0 = arith.constant 0 : index
    %c0_0 = arith.constant 0 : index
    %0 = vector.load %arg1[%c0, %c0_0] : memref<8x768xbf16, #tpu.memory_space<vmem>>, vector<8x768xbf16>
    %1 = vector.extract_strided_slice %0 {offsets = [0, 0], sizes = [8, 640], strides = [1, 1]} : vector<8x768xbf16> to vector<8x640xbf16>
    %2 = vector.extract_strided_slice %0 {offsets = [0, 1], sizes = [8, 640], strides = [1, 1]} : vector<8x768xbf16> to vector<8x640xbf16>
    %3 = vector.extract_strided_slice %0 {offsets = [0, 2], sizes = [8, 640], strides = [1, 1]} : vector<8x768xbf16> to vector<8x640xbf16>
    %4 = vector.extract_strided_slice %0 {offsets = [0, 18], sizes = [8, 640], strides = [1, 1]} : vector<8x768xbf16> to vector<8x640xbf16>
    %5 = vector.extract_strided_slice %0 {offsets = [0, 19], sizes = [8, 640], strides = [1, 1]} : vector<8x768xbf16> to vector<8x640xbf16>
    %6 = vector.extract_strided_slice %0 {offsets = [0, 20], sizes = [8, 640], strides = [1, 1]} : vector<8x768xbf16> to vector<8x640xbf16>
    %7 = vector.extract_strided_slice %0 {offsets = [0, 36], sizes = [8, 640], strides = [1, 1]} : vector<8x768xbf16> to vector<8x640xbf16>
    %8 = vector.extract_strided_slice %0 {offsets = [0, 37], sizes = [8, 640], strides = [1, 1]} : vector<8x768xbf16> to vector<8x640xbf16>
    %9 = vector.extract_strided_slice %0 {offsets = [0, 38], sizes = [8, 640], strides = [1, 1]} : vector<8x768xbf16> to vector<8x640xbf16>
    %10 = tpu.concatenate %1, %2, %3, %4, %5, %6, %7, %8, %9 in 0 : vector<8x640xbf16>, vector<8x640xbf16>, vector<8x640xbf16>, vector<8x640xbf16>, vector<8x640xbf16>, vector<8x640xbf16>, vector<8x640xbf16>, vector<8x640xbf16>, vector<8x640xbf16> -> vector<72x640xbf16>
    %c0_1 = arith.constant 0 : index
    %c0_2 = arith.constant 0 : index
    %11 = vector.load %arg2[%c0_1, %c0_2] : memref<8x72xbf16, #tpu.memory_space<vmem>>, vector<8x72xbf16>
    %cst = arith.constant dense<0.000000e+00> : vector<8x640xf32>
    %12 = tpu.matmul %11, %10, %cst {dimension_numbers = #tpu.dot_dimension_numbers<[1], [0], [0], [1], [0, 0, 1, 1], [], []>} : vector<8x72xbf16>, vector<72x640xbf16>, vector<8x640xf32> -> vector<8x640xf32>
    %c0_3 = arith.constant 0 : index
    %c0_4 = arith.constant 0 : index
    %13 = vector.load %arg3[%c0_3, %c0_4] : memref<8x1xf32, #tpu.memory_space<vmem>>, vector<8x1xf32>
    %14 = vector.broadcast %13 : vector<8x1xf32> to vector<8x640xf32>
    %15 = arith.addf %12, %14 : vector<8x640xf32>
    %cst_5 = arith.constant 0.000000e+00 : f32
    %16 = vector.broadcast %cst_5 : f32 to vector<8x640xf32>
    %17 = arith.maximumf %15, %16 : vector<8x640xf32>
    %c0_6 = arith.constant 0 : index
    %c0_7 = arith.constant 0 : index
    %18 = vector.load %arg6[%c0_6, %c0_7] : memref<1x640xf32, #tpu.memory_space<vmem>>, vector<1x640xf32>
    %19 = vector.broadcast %18 : vector<1x640xf32> to vector<8x640xf32>
    %20 = arith.mulf %17, %19 : vector<8x640xf32>
    %21 = arith.truncf %20 : vector<8x640xf32> to vector<8x640xbf16>
    %cst_8 = arith.constant 0.000000e+00 : bf16
    %22 = vector.broadcast %cst_8 : bf16 to vector<8x19xbf16>
    %23 = tpu.concatenate %22, %21, %22 in 1 : vector<8x19xbf16>, vector<8x640xbf16>, vector<8x19xbf16> -> vector<8x678xbf16>
    %24 = vector.extract_strided_slice %23 {offsets = [0, 0], sizes = [8, 640], strides = [1, 1]} : vector<8x678xbf16> to vector<8x640xbf16>
    %25 = vector.extract_strided_slice %23 {offsets = [0, 1], sizes = [8, 640], strides = [1, 1]} : vector<8x678xbf16> to vector<8x640xbf16>
    %26 = vector.extract_strided_slice %23 {offsets = [0, 2], sizes = [8, 640], strides = [1, 1]} : vector<8x678xbf16> to vector<8x640xbf16>
    %27 = vector.extract_strided_slice %23 {offsets = [0, 18], sizes = [8, 640], strides = [1, 1]} : vector<8x678xbf16> to vector<8x640xbf16>
    %28 = vector.extract_strided_slice %23 {offsets = [0, 19], sizes = [8, 640], strides = [1, 1]} : vector<8x678xbf16> to vector<8x640xbf16>
    %29 = vector.extract_strided_slice %23 {offsets = [0, 20], sizes = [8, 640], strides = [1, 1]} : vector<8x678xbf16> to vector<8x640xbf16>
    %30 = vector.extract_strided_slice %23 {offsets = [0, 36], sizes = [8, 640], strides = [1, 1]} : vector<8x678xbf16> to vector<8x640xbf16>
    %31 = vector.extract_strided_slice %23 {offsets = [0, 37], sizes = [8, 640], strides = [1, 1]} : vector<8x678xbf16> to vector<8x640xbf16>
    %32 = vector.extract_strided_slice %23 {offsets = [0, 38], sizes = [8, 640], strides = [1, 1]} : vector<8x678xbf16> to vector<8x640xbf16>
    %33 = tpu.concatenate %24, %25, %26, %27, %28, %29, %30, %31, %32 in 0 : vector<8x640xbf16>, vector<8x640xbf16>, vector<8x640xbf16>, vector<8x640xbf16>, vector<8x640xbf16>, vector<8x640xbf16>, vector<8x640xbf16>, vector<8x640xbf16>, vector<8x640xbf16> -> vector<72x640xbf16>
    %c0_9 = arith.constant 0 : index
    %c0_10 = arith.constant 0 : index
    %34 = vector.load %arg4[%c0_9, %c0_10] : memref<8x72xbf16, #tpu.memory_space<vmem>>, vector<8x72xbf16>
    %cst_11 = arith.constant dense<0.000000e+00> : vector<8x640xf32>
    %35 = tpu.matmul %34, %33, %cst_11 {dimension_numbers = #tpu.dot_dimension_numbers<[1], [0], [0], [1], [0, 0, 1, 1], [], []>} : vector<8x72xbf16>, vector<72x640xbf16>, vector<8x640xf32> -> vector<8x640xf32>
    %c0_12 = arith.constant 0 : index
    %c0_13 = arith.constant 0 : index
    %36 = vector.load %arg5[%c0_12, %c0_13] : memref<8x1xf32, #tpu.memory_space<vmem>>, vector<8x1xf32>
    %37 = vector.broadcast %36 : vector<8x1xf32> to vector<8x640xf32>
    %38 = arith.addf %35, %37 : vector<8x640xf32>
    %cst_14 = arith.constant 0.000000e+00 : f32
    %39 = vector.broadcast %cst_14 : f32 to vector<8x640xf32>
    %40 = arith.maximumf %38, %39 : vector<8x640xf32>
    %cst_15 = arith.constant 0.000000e+00 : f32
    %41 = vector.broadcast %cst_15 : f32 to vector<8x128xf32>
    %42 = tpu.concatenate %40, %41 in 1 : vector<8x640xf32>, vector<8x128xf32> -> vector<8x768xf32>
    %43 = vector.extract_strided_slice %42 {offsets = [0, 0], sizes = [8, 640], strides = [1, 1]} : vector<8x768xf32> to vector<8x640xf32>
    %44 = vector.extract_strided_slice %42 {offsets = [0, 1], sizes = [8, 640], strides = [1, 1]} : vector<8x768xf32> to vector<8x640xf32>
    %45 = arith.maximumf %43, %44 : vector<8x640xf32>
    %46 = vector.extract_strided_slice %42 {offsets = [0, 18], sizes = [8, 640], strides = [1, 1]} : vector<8x768xf32> to vector<8x640xf32>
    %47 = vector.extract_strided_slice %42 {offsets = [0, 19], sizes = [8, 640], strides = [1, 1]} : vector<8x768xf32> to vector<8x640xf32>
    %48 = arith.maximumf %46, %47 : vector<8x640xf32>
    %49 = arith.maximumf %45, %48 : vector<8x640xf32>
    %50 = tpu.iota {dimensions = array<i32: 0>} : vector<640x128xi32>
    %c0_16 = arith.constant 0 : index
    %c0_17 = arith.constant 0 : index
    %51 = vector.load %arg7[%c0_16, %c0_17] : memref<1x128xi32, #tpu.memory_space<vmem>>, vector<1x128xi32>
    %52 = vector.broadcast %51 : vector<1x128xi32> to vector<640x128xi32>
    %53 = arith.cmpi eq, %50, %52 : vector<640x128xi32>
    %cst_18 = arith.constant 1.000000e+00 : f32
    %cst_19 = arith.constant 0.000000e+00 : f32
    %54 = vector.broadcast %cst_18 : f32 to vector<640x128xf32>
    %55 = vector.broadcast %cst_19 : f32 to vector<640x128xf32>
    %56 = arith.select %53, %54, %55 : vector<640x128xi1>, vector<640x128xf32>
    %57 = arith.truncf %56 : vector<640x128xf32> to vector<640x128xbf16>
    %58 = arith.truncf %49 : vector<8x640xf32> to vector<8x640xbf16>
    %cst_20 = arith.constant dense<0.000000e+00> : vector<8x128xf32>
    %59 = tpu.matmul %58, %57, %cst_20 {dimension_numbers = #tpu.dot_dimension_numbers<[1], [0], [0], [1], [0, 0, 1, 1], [], []>} : vector<8x640xbf16>, vector<640x128xbf16>, vector<8x128xf32> -> vector<8x128xf32>
    %c0_21 = arith.constant 0 : index
    %c0_22 = arith.constant 0 : index
    %60 = vector.load %arg8[%c0_21, %c0_22] : memref<8x128xf32, #tpu.memory_space<vmem>>, vector<8x128xf32>
    tpu.vector_store %arg8[%c0_21, %c0_22], %59 {strides = array<i32>} : memref<8x128xf32, #tpu.memory_space<vmem>>, vector<8x128xf32>,
    return
  }
  func.func @transform_0(%arg0: i32) -> (i32, i32) {
    %c0_i32 = arith.constant 0 : i32
    %c0_i32_0 = arith.constant 0 : i32
    %c0_i32_1 = arith.constant 0 : i32
    return %c0_i32, %c0_i32_0 : i32, i32
  }
  func.func @transform_1(%arg0: i32) -> (i32, i32) {
    %c0_i32 = arith.constant 0 : i32
    %c0_i32_0 = arith.constant 0 : i32
    %c0_i32_1 = arith.constant 0 : i32
    return %c0_i32, %c0_i32_0 : i32, i32
  }
  func.func @transform_2(%arg0: i32) -> (i32, i32) {
    %c0_i32 = arith.constant 0 : i32
    %c0_i32_0 = arith.constant 0 : i32
    %c0_i32_1 = arith.constant 0 : i32
    return %c0_i32, %c0_i32_0 : i32, i32
  }
  func.func @transform_3(%arg0: i32) -> (i32, i32) {
    %c0_i32 = arith.constant 0 : i32
    %c0_i32_0 = arith.constant 0 : i32
    %c0_i32_1 = arith.constant 0 : i32
    return %c0_i32, %c0_i32_0 : i32, i32
  }
  func.func @transform_4(%arg0: i32) -> (i32, i32) {
    %c0_i32 = arith.constant 0 : i32
    %c0_i32_0 = arith.constant 0 : i32
    %c0_i32_1 = arith.constant 0 : i32
    return %c0_i32, %c0_i32_0 : i32, i32
  }
  func.func @transform_5(%arg0: i32) -> (i32, i32) {
    %c0_i32 = arith.constant 0 : i32
    %c0_i32_0 = arith.constant 0 : i32
    %c0_i32_1 = arith.constant 0 : i32
    return %c0_i32, %c0_i32_0 : i32, i32
  }
  func.func @transform_6(%arg0: i32) -> (i32, i32) {
    %c0_i32 = arith.constant 0 : i32
    %c0_i32_0 = arith.constant 0 : i32
    %c0_i32_1 = arith.constant 0 : i32
    return %c0_i32, %c0_i32_0 : i32, i32
  }
  func.func @transform_7(%arg0: i32) -> (i32, i32) {
    %c0_i32 = arith.constant 0 : i32
    %c0_i32_0 = arith.constant 0 : i32
    %c0_i32_1 = arith.constant 0 : i32
    return %c0_i32, %c0_i32_0 : i32, i32
  }
}

</mosaic_0001>

<bundles_post_ra>
// kernel: tpu_custom_call.1
= control target key start
LH: loop header
LB: loop body
LE: loop exit
PB: predicated region body
PF: predicated region fallthrough
CT: control target
= control target key end

     0   :  { %12 = vsyncpa [#allocation3], 0  ;;  %s2164_s0 = inlined_call_operand.hbm [shape: bf16[8,768], index: 0, kind: input, shape index: {}]   ;;  %s2165_s1 = inlined_call_operand.vmem [shape: bf16[8,72], index: 1, kind: input, shape index: {}]   ;;  %s2166_s2 = inlined_call_operand.vmem [shape: f32[8,1], index: 2, kind: input, shape index: {}]   ;;  %s2167_s3 = inlined_call_operand.vmem [shape: bf16[8,72], index: 3, kind: input, shape index: {}]   ;;  %s2168_s4 = inlined_call_operand.vmem [shape: f32[8,1], index: 4, kind: input, shape index: {}]   ;;  %s2169_s5 = inlined_call_operand.vmem [shape: f32[1,640], index: 5, kind: input, shape index: {}]   ;;  %s2170_s6 = inlined_call_operand.vmem [shape: s32[1,128], index: 6, kind: input, shape index: {}]   ;;  %s2171_s7 = inlined_call_operand.hbm [shape: f32[8,128], index: 7, kind: output, shape index: {}]  }
   0x1   :  { %13 = vsyncpa [#allocation4], 0  ;;  %s19_s26 = sshll.u32 %s2164_s0, 4  ;;  %s1373_s27 = smov [#allocation2]   ;;  %s20_s26 = int_to_ptr.hbm [resolvable:$true] %s19_s26 }
   0x2   :  { %s21_s28 = sshll.u32 %s1373_s27, 4  ;;  %s22_s28 = int_to_ptr.vmem [resolvable:$true] %s21_s28 }
   0x3   :  { %24 = dma.hbm_to_vmem [thread:$0]  %s20_s26, 384, %s22_s28, [#allocation3]  }
   0x4   :  { %1369 = dma.done.wait [#allocation3], 384  }
   0x5   :  { %1370 = vsyncadd [#allocation3], 4294966912  ;;  %v43_v0 = vld [vmem:[#allocation2 + $0x8] sm:$0xff]  ;;  %s1374_s29 = smov 91   ;;  %s1375_s30 = smov 92   ;;  %v44_v5 = vld [vmem:[#allocation2 + $0x10] sm:$0xff] }
   0x6   :  { %v50_v1 = vunpack.c.l.b16 %v43_v0  ;;  %v51_v3 = vunpack.c.h.b16 %v43_v0  ;;  %s1376_s0 = smov 90   ;;  %s1377_s8 = smov 108   ;;  %v52_v6 = vunpack.c.l.b16 %v44_v5  ;;  %v42_v8 = vld [vmem:[#allocation2] sm:$0xff]  ;;  %v58_v14 = vunpack.c.h.b16 %v44_v5 }
   0x7   :  { %s1378_s9 = smov 109   ;;  %s1379_s10 = smov 126   ;;  %v49_v9 = vunpack.c.h.b16 %v42_v8  ;;  %v48_v10 = vunpack.c.l.b16 %v42_v8  ;;  %vm198_vm0 = vcmask 736256   ;;  %vm204_vm1 = vcmask 1043456   ;;  %v1591_v60 = vld [vmem:[%s2165_s1] sm:$0xf] }
   0x8   :  { %v1430_v2 = vpack.c.b16 %v50_v1, %v50_v1  ;;  %v1438_v4 = vpack.c.b16 %v51_v3, %v51_v3  ;;  %s1380_s11 = smov 127   ;;  %s1381_s12 = smov 110   ;;  %v1464_v7 = vpack.c.b16 %v52_v6, %v52_v6  ;;  %v59_v16 = vpack.c.b16 %v58_v14, %v58_v14 }
   0x9   :  { %v1472_v11 = vpack.c.b16 %v49_v9, %v49_v9  ;;  %v1474_v12 = vpack.c.b16 %v48_v10, %v48_v10  ;;  %vm180_vm2 = vcmask 744448   ;;  %vm162_vm3 = vcmask 752640   ;;  %s1184_s24 = sshll.u32 %s2171_s7, 4  ;;  %s1185_s24 = int_to_ptr.hbm [resolvable:$true] %s1184_s24 }
   0xa   :  { %172 = vrot.lane.b32.xlu2 %v1430_v2, %s1374_s29  ;;  %154 = vrot.lane.b32.xlu1 %v1430_v2, %s1375_s30  ;;  %vm126_vm4 = vcmask 891904   ;;  %vm144_vm5 = vcmask 883712   ;;  %vm90_vm6 = vcmask 1031168   ;;  %vm108_vm7 = vcmask 900096  }
   0xb   :  { %190 = vrot.lane.b32.xlu0 %v1430_v2, %s1376_s0  ;;  %vm72_vm8 = vcmask 1039360   ;;  %vm292_vm9 = vcmask 588800   ;;  %vm424_vm10 = vcmask 154624  }
  0x12   :  { %174 = vrot.lane.b32.xlu2 %v1438_v4, %s1374_s29  ;;  %156 = vrot.lane.b32.xlu1 %v1438_v4, %s1375_s30 }
  0x13   :  { %192 = vrot.lane.b32.xlu0 %v1438_v4, %s1376_s0 }
  0x1a   :  { %136 = vrot.lane.b32.xlu2 %v1430_v2, %s1377_s8  ;;  %120 = vrot.lane.b32.xlu1 %v1438_v4, %s1378_s9 }
  0x1b   :  { %118 = vrot.lane.b32.xlu0 %v1430_v2, %s1378_s9 }
  0x22   :  { %84 = vrot.lane.b32.xlu2 %v1438_v4, %s1379_s10  ;;  %82 = vrot.lane.b32.xlu1 %v1430_v2, %s1379_s10 }
  0x23   :  { %138 = vrot.lane.b32.xlu0 %v1438_v4, %s1377_s8 }
  0x2a   :  { %64 = vrot.lane.b32.xlu2 %v1430_v2, %s1380_s11  ;;  %102 = vrot.lane.b32.xlu1 %v1438_v4, %s1381_s12 }
  0x2b   :  { %100 = vrot.lane.b32.xlu0 %v1430_v2, %s1381_s12 }
  0x32   :  { %158 = vrot.lane.b32.xlu2 %v1464_v7, %s1375_s30  ;;  %194 = vrot.lane.b32.xlu1 %v1464_v7, %s1376_s0 }
  0x33   :  { %66 = vrot.lane.b32.xlu0 %v1438_v4, %s1380_s11 }
  0x3a   :  { %188 = vrot.lane.b32.xlu2 %v1472_v11, %s1376_s0  ;;  %186 = vrot.lane.b32.xlu1 %v1474_v12, %s1376_s0 }
  0x3b   :  { %176 = vrot.lane.b32.xlu0 %v1464_v7, %s1374_s29 }
  0x42   :  { %150 = vrot.lane.b32.xlu2 %v1474_v12, %s1375_s30  ;;  %140 = vrot.lane.b32.xlu1 %v1464_v7, %s1377_s8 }
  0x43   :  { %122 = vrot.lane.b32.xlu0 %v1464_v7, %s1378_s9 }
  0x4a   :  { %170 = vrot.lane.b32.xlu2 %v1472_v11, %s1374_s29  ;;  %168 = vrot.lane.b32.xlu1 %v1474_v12, %s1374_s29 }
  0x4b   :  { %152 = vrot.lane.b32.xlu0 %v1472_v11, %s1375_s30 }
  0x52   :  { %114 = vrot.lane.b32.xlu2 %v1474_v12, %s1378_s9  ;;  %104 = vrot.lane.b32.xlu1 %v1464_v7, %s1381_s12 }
  0x53   :  { %86 = vrot.lane.b32.xlu0 %v1464_v7, %s1379_s10 }
  0x5a   :  { %134 = vrot.lane.b32.xlu2 %v1472_v11, %s1377_s8  ;;  %132 = vrot.lane.b32.xlu1 %v1474_v12, %s1377_s8 }
  0x5b   :  { %116 = vrot.lane.b32.xlu0 %v1472_v11, %s1378_s9 }
  0x62   :  { %80 = vrot.lane.b32.xlu2 %v1472_v11, %s1379_s10  ;;  %78 = vrot.lane.b32.xlu1 %v1474_v12, %s1379_s10 }
  0x63   :  { %68 = vrot.lane.b32.xlu0 %v1464_v7, %s1380_s11 }
  0x64   :  { %v1512_v13 = vpop.permute.xlu2 %172 }
  0x6a   :  { %60 = vrot.lane.b32.xlu2 %v1474_v12, %s1380_s11  ;;  %98 = vrot.lane.b32.xlu1 %v1472_v11, %s1381_s12 }
  0x6b   :  { %96 = vrot.lane.b32.xlu0 %v1474_v12, %s1381_s12 }
  0x6c   :  { %v1520_v15 = vpop.permute.xlu2 %174 }
  0x6d   :  { %v183_v26 = vsel %vm180_vm2, %v1512_v13, %v1520_v15 }
  0x72   :  { %160 = vrot.lane.b32.xlu2 %v59_v16, %s1375_s30  ;;  %196 = vrot.lane.b32.xlu1 %v59_v16, %s1376_s0 }
  0x73   :  { %62 = vrot.lane.b32.xlu0 %v1472_v11, %s1380_s11 }
  0x74   :  { %v1526_v17 = vpop.permute.xlu2 %136 }
  0x7a   :  { %142 = vrot.lane.b32.xlu2 %v59_v16, %s1377_s8  ;;  %124 = vrot.lane.b32.xlu1 %v59_v16, %s1378_s9 }
  0x7b   :  { %178 = vrot.lane.b32.xlu0 %v59_v16, %s1374_s29 }
  0x7c   :  { %v1531_v18 = vpop.permute.xlu2 %84  ;;  %v1533_v19 = vpop.permute.xlu1 %154 }
  0x7d   :  { %v191_v20 = vpop.permute.xlu0 %190 }
  0x82   :  { %70 = vrot.lane.b32.xlu2 %v59_v16, %s1380_s11  ;;  %106 = vrot.lane.b32.xlu1 %v59_v16, %s1381_s12 }
  0x83   :  { %88 = vrot.lane.b32.xlu0 %v59_v16, %s1379_s10 }
  0x84   :  { %v1538_v21 = vpop.permute.xlu2 %64  ;;  %v157_v22 = vpop.permute.xlu1 %156 }
  0x85   :  { %v193_v23 = vpop.permute.xlu0 %192  ;;  %v165_v27 = vsel %vm162_vm3, %v1533_v19, %v157_v22 }
  0x86   :  { %v201_v24 = vsel %vm198_vm0, %v191_v20, %v193_v23  ;;  %v275_v28 = vsel %vm204_vm1, %v165_v27, %v183_v26 }
  0x87   :  { %v303_v25 = vsel %vm204_vm1, %v201_v24, 0 }
  0x88   :  { %340 = vmatpush.bf16.msra.mxu3 %v303_v25 }
  0x8c   :  { %341 = vmatpush.bf16.msra.mxu3 %v275_v28  ;;  %v1548_v29 = vpop.permute.xlu2 %158  ;;  %v121_v30 = vpop.permute.xlu1 %120 }
  0x8d   :  { %v1550_v31 = vpop.permute.xlu0 %118  ;;  %v166_v55 = vsel %vm162_vm3, %v157_v22, %v1548_v29 }
  0x8e   :  { %v129_v36 = vsel %vm126_vm4, %v1550_v31, %v121_v30 }
  0x94   :  { %v1552_v32 = vpop.permute.xlu1 %82  ;;  %v189_v33 = vpop.permute.xlu2 %188 }
  0x95   :  { %v139_v34 = vpop.permute.xlu0 %138  ;;  %v200_v35 = vsel %vm198_vm0, %v189_v33, %v191_v20  ;;  %v93_v42 = vsel %vm90_vm6, %v1552_v32, %v1531_v18 }
  0x96   :  { %v147_v37 = vsel %vm144_vm5, %v1526_v17, %v139_v34  ;;  %v300_v38 = vsel %vm204_vm1, %v200_v35, 0 }
  0x97   :  { %327 = vmatpush.bf16.msra.mxu1 %v300_v38  ;;  %v255_v39 = vsel %vm204_vm1, %v129_v36, %v147_v37  ;;  %v1382_v37 = vmov 0   ;;  %v286_v38 = vld [vmem:[%s2166_s2] sm:$0xff] }
  0x98   :  { %342 = vmatpush.bf16.msra.mxu3 %v255_v39  ;;  %1298 = vset.pattern.permute.xlu0 %v1382_v37 }
  0x99   :  { %1299 = vset.pattern.permute.xlu1 %v1382_v37  ;;  %289 = vperm.xlu0 %1298, %v286_v38  }
  0x9c   :  { %v103_v40 = vpop.permute.xlu1 %102  ;;  %v151_v46 = vpop.permute.xlu2 %150 }
  0x9d   :  { %v1561_v41 = vpop.permute.xlu0 %100 }
  0x9e   :  { %v111_v43 = vsel %vm108_vm7, %v1561_v41, %v103_v40 }
  0x9f   :  { %v235_v44 = vsel %vm204_vm1, %v93_v42, %v111_v43 }
  0xa0   :  { %343 = vmatpush.bf16.msra.mxu3 %v235_v44 }
  0xa4   :  { %v1569_v45 = vpop.permute.xlu1 %194  ;;  %v171_v58 = vpop.permute.xlu2 %170 }
  0xa5   :  { %v67_v47 = vpop.permute.xlu0 %66  ;;  %v202_v48 = vsel %vm198_vm0, %v193_v23, %v1569_v45  ;;  %v182_v8 = vsel %vm180_vm2, %v171_v58, %v1512_v13 }
  0xa6   :  { %v75_v49 = vsel %vm72_vm8, %v1538_v21, %v67_v47  ;;  %v306_v50 = vsel %vm204_vm1, %v202_v48, 0 }
  0xa7   :  { %v215_v51 = vsel %vm204_vm1, %v1430_v2, %v75_v49 }
  0xa8   :  { %344 = vmatpush.bf16.msra.mxu3 %v215_v51 }
  0xab   :  { %1196 = vmatmul.msk.bf16.vlgmr.msra.gmra.mxu3 %vm292_vm9, %v1591_v60 }
  0xac   :  { %353 = vmatpush.bf16.msrb.mxu3 %v306_v50  ;;  %v187_v52 = vpop.permute.xlu1 %186  ;;  %v115_v2 = vpop.permute.xlu2 %114 }
  0xad   :  { %v1578_v53 = vpop.permute.xlu0 %176  ;;  %v199_v54 = vsel %vm198_vm0, %v187_v52, %v189_v33 }
  0xae   :  { %v184_v56 = vsel %vm180_vm2, %v1520_v15, %v1578_v53  ;;  %v297_v57 = vsel %vm204_vm1, %v199_v54, 0 }
  0xaf   :  { %v279_v59 = vsel %vm204_vm1, %v166_v55, %v184_v56  ;;  %314 = vmatpush.bf16.msra.mxu0 %v297_v57 }
  0xb0   :  { %354 = vmatpush.bf16.msrb.mxu3 %v279_v59 }
  0xb4   :  { %v1595_v61 = vpop.permute.xlu1 %140  ;;  %v135_v16 = vpop.permute.xlu2 %134 }
  0xb5   :  { %v1597_v62 = vpop.permute.xlu0 %122  ;;  %v148_v63 = vsel %vm144_vm5, %v139_v34, %v1595_v61  ;;  %v146_v28 = vsel %vm144_vm5, %v135_v16, %v1526_v17 }
  0xb6   :  { %v130_v0 = vsel %vm126_vm4, %v121_v30, %v1597_v62 }
  0xb7   :  { %v259_v1 = vsel %vm204_vm1, %v130_v0, %v148_v63 }
  0xb8   :  { %355 = vmatpush.bf16.msrb.mxu3 %v259_v1 }
  0xbc   :  { %v169_v3 = vpop.permute.xlu1 %168  ;;  %v81_v25 = vpop.permute.xlu2 %80 }
  0xbd   :  { %v153_v5 = vpop.permute.xlu0 %152  ;;  %v181_v6 = vsel %vm180_vm2, %v169_v3, %v171_v58  ;;  %v92_v42 = vsel %vm90_vm6, %v81_v25, %v1552_v32 }
  0xbe   :  { %v163_v9 = vsel %vm162_vm3, %v151_v46, %v153_v5  ;;  %v164_v10 = vsel %vm162_vm3, %v153_v5, %v1533_v19 }
  0xbf   :  { %v267_v14 = vsel %vm204_vm1, %v163_v9, %v181_v6  ;;  %v271_v15 = vsel %vm204_vm1, %v164_v10, %v182_v8 }
  0xc0   :  { %315 = vmatpush.bf16.msra.mxu0 %v267_v14  ;;  %328 = vmatpush.bf16.msra.mxu1 %v271_v15  ;;  %v381_v15 = vld [vmem:[%s2169_s5] sm:$0x1f]  ;;  %s1383_s5 = smov 19  }
  0xc4   :  { %v1612_v20 = vpop.permute.xlu1 %104  ;;  %v61_v39 = vpop.permute.xlu2 %60 }
  0xc5   :  { %v1614_v22 = vpop.permute.xlu0 %86  ;;  %v112_v23 = vsel %vm108_vm7, %v103_v40, %v1612_v20 }
  0xc6   :  { %v94_v13 = vsel %vm90_vm6, %v1531_v18, %v1614_v22 }
  0xc7   :  { %v239_v19 = vsel %vm204_vm1, %v94_v13, %v112_v23 }
  0xc8   :  { %356 = vmatpush.bf16.msrb.mxu3 %v239_v19  ;;  %v383_v19 = vperm.slane %v381_v15, 0 }
  0xcc   :  { %v133_v24 = vpop.permute.xlu1 %132  ;;  %v161_v49 = vpop.permute.xlu2 %160 }
  0xcd   :  { %v117_v26 = vpop.permute.xlu0 %116  ;;  %v145_v27 = vsel %vm144_vm5, %v133_v24, %v135_v16  ;;  %v167_v58 = vsel %vm162_vm3, %v1548_v29, %v161_v49  ;;  %v384_v24 = vperm.slane %v381_v15, 1  ;;  %v387_v49 = vperm.slane %v381_v15, 4 }
  0xce   :  { %v127_v30 = vsel %vm126_vm4, %v115_v2, %v117_v26  ;;  %v128_v33 = vsel %vm126_vm4, %v117_v26, %v1550_v31  ;;  %v385_v26 = vperm.slane %v381_v15, 2 }
  0xcf   :  { %v247_v34 = vsel %vm204_vm1, %v127_v30, %v145_v27  ;;  %v251_v18 = vsel %vm204_vm1, %v128_v33, %v146_v28  ;;  %v386_v30 = vperm.slane %v381_v15, 3 }
  0xd0   :  { %316 = vmatpush.bf16.msra.mxu0 %v247_v34  ;;  %329 = vmatpush.bf16.msra.mxu1 %v251_v18 }
  0xd4   :  { %v79_v35 = vpop.permute.xlu1 %78  ;;  %v143_v57 = vpop.permute.xlu2 %142 }
  0xd5   :  { %v69_v36 = vpop.permute.xlu0 %68  ;;  %v91_v46 = vsel %vm90_vm6, %v79_v35, %v81_v25  ;;  %v149_v63 = vsel %vm144_vm5, %v1595_v61, %v143_v57 }
  0xd6   :  { %v76_v17 = vsel %vm72_vm8, %v67_v47, %v69_v36 }
  0xd7   :  { %v219_v31 = vsel %vm204_vm1, %v1438_v4, %v76_v17 }
  0xd8   :  { %357 = vmatpush.bf16.msrb.mxu3 %v219_v31 }
  0xdb   :  { %1197 = vmatmul.msk.bf16.vlgmr.msrb.gmra.mxu3 %vm292_vm9, %v1591_v60 }
  0xdc   :  { %v99_v40 = vpop.permute.xlu1 %98  ;;  %v71_v2 = vpop.permute.xlu2 %70 }
  0xdd   :  { %v97_v43 = vpop.permute.xlu0 %96  ;;  %v110_v44 = vsel %vm108_vm7, %v99_v40, %v1561_v41 }
  0xde   :  { %v109_v47 = vsel %vm108_vm7, %v97_v43, %v99_v40  ;;  %v231_v48 = vsel %vm204_vm1, %v92_v42, %v110_v44 }
  0xdf   :  { %v227_v4 = vsel %vm204_vm1, %v91_v46, %v109_v47  ;;  %330 = vmatpush.bf16.msra.mxu1 %v231_v48 }
  0xe0   :  { %317 = vmatpush.bf16.msra.mxu0 %v227_v4 }
  0xe4   :  { %v197_v50 = vpop.permute.xlu1 %196 }
  0xe5   :  { %v63_v51 = vpop.permute.xlu0 %62  ;;  %v203_v32 = vsel %vm198_vm0, %v1569_v45, %v197_v50 }
  0xe6   :  { %v73_v52 = vsel %vm72_vm8, %v61_v39, %v63_v51  ;;  %v74_v41 = vsel %vm72_vm8, %v63_v51, %v1538_v21  ;;  %v309_v54 = vsel %vm204_vm1, %v203_v32, 0 }
  0xe7   :  { %v207_v55 = vsel %vm204_vm1, %v1474_v12, %v73_v52  ;;  %v211_v56 = vsel %vm204_vm1, %v1472_v11, %v74_v41 }
  0xe8   :  { %318 = vmatpush.bf16.msra.mxu0 %v207_v55  ;;  %331 = vmatpush.bf16.msra.mxu1 %v211_v56 }
  0xeb   :  { %1194 = vmatmul.msk.bf16.vlgmr.msra.gmra.mxu0 %vm292_vm9, %v1591_v60  ;;  %1195 = vmatmul.msk.bf16.vlgmr.msra.gmra.mxu1 %vm292_vm9, %v1591_v60 }
  0xec   :  { %366 = vmatpush.bf16.msrb.mxu0 %v309_v54  ;;  %v125_v45 = vpop.permute.xlu1 %124 }
  0xed   :  { %v179_v21 = vpop.permute.xlu0 %178  ;;  %v131_v59 = vsel %vm126_vm4, %v1597_v62, %v125_v45  ;;  %v77_v62 = vsel %vm72_vm8, %v69_v36, %v71_v2 }
  0xee   :  { %v185_v12 = vsel %vm180_vm2, %v1578_v53, %v179_v21  ;;  %v263_v0 = vsel %vm204_vm1, %v131_v59, %v149_v63  ;;  %v223_v61 = vsel %vm204_vm1, %v1464_v7, %v77_v62 }
  0xef   :  { %v283_v11 = vsel %vm204_vm1, %v167_v58, %v185_v12 }
  0xf0   :  { %367 = vmatpush.bf16.msrb.mxu0 %v283_v11 }
  0xf4   :  { %368 = vmatpush.bf16.msrb.mxu0 %v263_v0  ;;  %v107_v1 = vpop.permute.xlu1 %106 }
  0xf5   :  { %v89_v3 = vpop.permute.xlu0 %88  ;;  %v113_v29 = vsel %vm108_vm7, %v1612_v20, %v107_v1 }
  0xf6   :  { %v95_v53 = vsel %vm90_vm6, %v1614_v22, %v89_v3 }
  0xf7   :  { %v243_v5 = vsel %vm204_vm1, %v95_v53, %v113_v29 }
  0xf8   :  { %369 = vmatpush.bf16.msrb.mxu0 %v243_v5 }
  0xfc   :  { %370 = vmatpush.bf16.msrb.mxu0 %v223_v61 }
  0xff   :  { %1198 = vmatmul.msk.bf16.vlgmr.msrb.gmra.mxu0 %vm292_vm9, %v1591_v60 }
 0x10b   :  { %v290_v10 = vpop.permute.xlu0 %289 }
 0x12e   :  { %v346_v6 = vpop.f32.mrf.mxu3 }
 0x12f   :  { %v347_v14 = vadd.f32 %v346_v6, %v290_v10 }
 0x131   :  { %v378_v25 = vmax.f32 %v347_v14, 0.0 }
 0x133   :  { %v395_v35 = vmul.f32 %v385_v26, %v378_v25 }
 0x136   :  { %v348_v8 = vpop.f32.mrf.mxu3 }
 0x15e   :  { %v359_v9 = vpop.f32.mrf.mxu3 }
 0x15f   :  { %v360_v20 = vadd.f32 %v359_v9, %v290_v10 }
 0x161   :  { %v379_v28 = vmax.f32 %v360_v20, 0.0 }
 0x163   :  { %v396_v36 = vmul.f32 %v386_v30, %v379_v28 }
 0x165   :  { %v399_v31 = vpack.c.bf16 %v396_v36, %v395_v35 }
 0x166   :  { %v361_v16 = vpop.f32.mrf.mxu3 }
 0x167   :  { %v407_v43 = vunpack.c.h.b16 %v399_v31  ;;  %v406_v44 = vunpack.c.l.b16 %v399_v31 }
 0x168   :  { %v320_v22 = vpop.f32.mrf.mxu0  ;;  %v333_v23 = vpop.f32.mrf.mxu1 }
 0x169   :  { %v321_v13 = vadd.f32 %v320_v22, %v290_v10  ;;  %v334_v7 = vadd.f32 %v333_v23, %v290_v10  ;;  %v412_v46 = vpack.c.b16 %v407_v43, %v407_v43  ;;  %v411_v47 = vpack.c.b16 %v406_v44, %v406_v44 }
 0x16b   :  { %v376_v60 = vmax.f32 %v321_v13, 0.0  ;;  %v377_v27 = vmax.f32 %v334_v7, 0.0 }
 0x16d   :  { %v393_v33 = vmul.f32 %v383_v19, %v376_v60  ;;  %v394_v34 = vmul.f32 %v384_v24, %v377_v27 }
 0x16f   :  { %v398_v18 = vpack.c.bf16 %v394_v34, %v393_v33 }
 0x170   :  { %v322_v37 = vpop.f32.mrf.mxu0  ;;  %v335_v38 = vpop.f32.mrf.mxu1 }
 0x171   :  { %v405_v17 = vunpack.c.h.b16 %v398_v18  ;;  %v404_v39 = vunpack.c.l.b16 %v398_v18 }
 0x173   :  { %v410_v40 = vpack.c.b16 %v405_v17, %v405_v17  ;;  %v409_v42 = vpack.c.b16 %v404_v39, %v404_v39 }
 0x175   :  { %416 = vrot.lane.b32.xlu2 %v410_v40, %s1383_s5  ;;  %414 = vrot.lane.b32.xlu1 %v409_v42, %s1383_s5 }
 0x17c   :  { %v372_v48 = vpop.f32.mrf.mxu0 }
 0x17d   :  { %v373_v4 = vadd.f32 %v372_v48, %v290_v10  ;;  %420 = vrot.lane.b32.xlu2 %v412_v46, %s1383_s5  ;;  %418 = vrot.lane.b32.xlu1 %v411_v47, %s1383_s5 }
 0x17f   :  { %v380_v50 = vmax.f32 %v373_v4, 0.0 }
 0x181   :  { %v397_v51 = vmul.f32 %v387_v49, %v380_v50 }
 0x183   :  { %v400_v32 = vpack.c.bf16 %v397_v51, %v397_v51 }
 0x184   :  { %v374_v52 = vpop.f32.mrf.mxu0 }
 0x185   :  { %v408_v41 = vunpack.c.l.b16 %v400_v32 }
 0x187   :  { %v413_v54 = vpack.c.b16 %v408_v41, %v408_v41 }
 0x189   :  { %422 = vrot.lane.b32.xlu0 %v413_v54, %s1383_s5 }
 0x1cf   :  { %v417_v55 = vpop.permute.xlu2 %416 }
 0x1d7   :  { %v421_v63 = vpop.permute.xlu2 %420 }
 0x1e7   :  { %v415_v56 = vpop.permute.xlu1 %414 }
 0x1e8   :  { %v1684_v57 = vsel %vm424_vm10, %v415_v56, %v417_v55  ;;  %v1687_v45 = vsel %vm424_vm10, 0, %v415_v56 }
 0x1e9   :  { %460 = vrot.lane.b32.xlu0 %v1687_v45, %s1379_s10  ;;  %496 = vrot.lane.b32.xlu2 %v1684_v57, %s1378_s9  ;;  %v437_v21 = vrot.slane %v1687_v45, 4  ;;  %v438_v58 = vrot.slane %v1684_v57, 4 }
 0x1ea   :  { %564 = vrot.lane.b32.xlu1 %v1684_v57, %s1376_s0 }
 0x1ef   :  { %v419_v59 = vpop.permute.xlu1 %418 }
 0x1f0   :  { %v1712_v1 = vsel %vm424_vm10, %v419_v59, %v421_v63  ;;  %v1720_v2 = vsel %vm424_vm10, %v417_v55, %v419_v59  ;;  %v1821_v59 = vld [vmem:[%s2167_s3] sm:$0xf] }
 0x1f1   :  { %545 = vrot.lane.b32.xlu0 %v437_v21, %s1374_s29  ;;  %528 = vrot.lane.b32.xlu2 %v1687_v45, %s1375_s30  ;;  %v440_v29 = vrot.slane %v1712_v1, 4  ;;  %v439_v53 = vrot.slane %v1720_v2, 4 }
 0x1f2   :  { %530 = vrot.lane.b32.xlu1 %v1684_v57, %s1375_s30 }
 0x1f9   :  { %445 = vrot.lane.b32.xlu0 %v438_v58, %s1380_s11  ;;  %513 = vrot.lane.b32.xlu2 %v438_v58, %s1377_s8 }
 0x1fa   :  { %562 = vrot.lane.b32.xlu1 %v1687_v45, %s1376_s0 }
 0x1fb   :  { %v423_v12 = vpop.permute.xlu0 %422 }
 0x1fc   :  { %v434_v11 = vsel %vm424_vm10, %v423_v12, 0  ;;  %v1738_v3 = vsel %vm424_vm10, %v421_v63, %v423_v12 }
 0x1fd   :  { %v442_v0 = vrot.slane %v434_v11, 4  ;;  %v441_v61 = vrot.slane %v1738_v3, 4 }
 0x201   :  { %443 = vrot.lane.b32.xlu0 %v437_v21, %s1380_s11  ;;  %511 = vrot.lane.b32.xlu2 %v437_v21, %s1377_s8 }
 0x202   :  { %462 = vrot.lane.b32.xlu1 %v1684_v57, %s1379_s10 }
 0x209   :  { %555 = vrot.lane.b32.xlu2 %v442_v0, %s1374_s29  ;;  %568 = vrot.lane.b32.xlu0 %v1712_v1, %s1376_s0 }
 0x20a   :  { %494 = vrot.lane.b32.xlu1 %v1687_v45, %s1378_s9 }
 0x211   :  { %534 = vrot.lane.b32.xlu0 %v1712_v1, %s1375_s30  ;;  %566 = vrot.lane.b32.xlu2 %v1720_v2, %s1376_s0 }
 0x212   :  { %547 = vrot.lane.b32.xlu1 %v438_v58, %s1374_s29 }
 0x219   :  { %498 = vrot.lane.b32.xlu0 %v1720_v2, %s1378_s9  ;;  %532 = vrot.lane.b32.xlu2 %v1720_v2, %s1375_s30 }
 0x21a   :  { %479 = vrot.lane.b32.xlu1 %v438_v58, %s1381_s12 }
 0x221   :  { %466 = vrot.lane.b32.xlu0 %v1712_v1, %s1379_s10  ;;  %464 = vrot.lane.b32.xlu2 %v1720_v2, %s1379_s10 }
 0x222   :  { %477 = vrot.lane.b32.xlu1 %v437_v21, %s1381_s12 }
 0x229   :  { %502 = vrot.lane.b32.xlu0 %v1738_v3, %s1378_s9  ;;  %570 = vrot.lane.b32.xlu2 %v1738_v3, %s1376_s0 }
 0x22a   :  { %572 = vrot.lane.b32.xlu1 %v434_v11, %s1376_s0 }
 0x231   :  { %551 = vrot.lane.b32.xlu0 %v440_v29, %s1374_s29  ;;  %536 = vrot.lane.b32.xlu2 %v1738_v3, %s1375_s30 }
 0x232   :  { %538 = vrot.lane.b32.xlu1 %v434_v11, %s1375_s30 }
 0x239   :  { %515 = vrot.lane.b32.xlu0 %v439_v53, %s1377_s8  ;;  %549 = vrot.lane.b32.xlu2 %v439_v53, %s1374_s29 }
 0x23a   :  { %500 = vrot.lane.b32.xlu1 %v1712_v1, %s1378_s9 }
 0x241   :  { %483 = vrot.lane.b32.xlu0 %v440_v29, %s1381_s12  ;;  %481 = vrot.lane.b32.xlu2 %v439_v53, %s1381_s12 }
 0x242   :  { %517 = vrot.lane.b32.xlu1 %v440_v29, %s1377_s8 }
 0x243   :  { %v1758_v5 = vpop.permute.xlu2 %496 }
 0x249   :  { %521 = vrot.lane.b32.xlu0 %v442_v0, %s1377_s8  ;;  %449 = vrot.lane.b32.xlu2 %v440_v29, %s1380_s11 }
 0x24a   :  { %447 = vrot.lane.b32.xlu1 %v439_v53, %s1380_s11 }
 0x24b   :  { %v529_v62 = vpop.permute.xlu2 %528 }
 0x251   :  { %553 = vrot.lane.b32.xlu0 %v441_v61, %s1374_s29  ;;  %504 = vrot.lane.b32.xlu2 %v434_v11, %s1378_s9 }
 0x252   :  { %468 = vrot.lane.b32.xlu1 %v1738_v3, %s1379_s10 }
 0x253   :  { %v1768_v6 = vpop.permute.xlu2 %513 }
 0x259   :  { %470 = vrot.lane.b32.xlu0 %v434_v11, %s1379_s10  ;;  %485 = vrot.lane.b32.xlu2 %v441_v61, %s1381_s12 }
 0x25a   :  { %519 = vrot.lane.b32.xlu1 %v441_v61, %s1377_s8 }
 0x25b   :  { %v461_v8 = vpop.permute.xlu0 %460  ;;  %v512_v9 = vpop.permute.xlu2 %511 }
 0x25c   :  { %v565_v10 = vpop.permute.xlu1 %564  ;;  %v523_v42 = vsel %vm144_vm5, %v512_v9, %v1768_v6 }
 0x261   :  { %453 = vrot.lane.b32.xlu0 %v442_v0, %s1380_s11  ;;  %451 = vrot.lane.b32.xlu2 %v441_v61, %s1380_s11 }
 0x262   :  { %487 = vrot.lane.b32.xlu1 %v442_v0, %s1381_s12 }
 0x263   :  { %v546_v14 = vpop.permute.xlu0 %545  ;;  %v1776_v15 = vpop.permute.xlu2 %555 }
 0x264   :  { %v531_v16 = vpop.permute.xlu1 %530 }
 0x265   :  { %v540_v38 = vsel %vm162_vm3, %v529_v62, %v531_v16 }
 0x26b   :  { %v1778_v20 = vpop.permute.xlu0 %445  ;;  %v567_v22 = vpop.permute.xlu2 %566 }
 0x26c   :  { %v563_v23 = vpop.permute.xlu1 %562  ;;  %v575_v13 = vsel %vm198_vm0, %v565_v10, %v567_v22 }
 0x26d   :  { %v574_v19 = vsel %vm198_vm0, %v563_v23, %v565_v10  ;;  %v672_v7 = vsel %vm204_vm1, %v575_v13, 0 }
 0x26e   :  { %v669_v24 = vsel %vm204_vm1, %v574_v19, 0  ;;  %699 = vmatpush.bf16.msra.mxu2 %v672_v7 }
 0x26f   :  { %686 = vmatpush.bf16.msrb.mxu1 %v669_v24 }
 0x273   :  { %v444_v25 = vpop.permute.xlu0 %443  ;;  %v533_v26 = vpop.permute.xlu2 %532 }
 0x274   :  { %v463_v60 = vpop.permute.xlu1 %462  ;;  %v541_v49 = vsel %vm162_vm3, %v531_v16, %v533_v26  ;;  %v455_v55 = vsel %vm72_vm8, %v444_v25, %v1778_v20 }
 0x275   :  { %v472_v32 = vsel %vm90_vm6, %v461_v8, %v463_v60  ;;  %v580_v56 = vsel %vm204_vm1, %v1687_v45, %v455_v55 }
 0x27b   :  { %v569_v27 = vpop.permute.xlu0 %568  ;;  %v1784_v28 = vpop.permute.xlu2 %464 }
 0x27c   :  { %v576_v30 = vsel %vm198_vm0, %v567_v22, %v569_v27  ;;  %v495_v33 = vpop.permute.xlu1 %494  ;;  %v659_v22 = vld [vmem:[%s2168_s4] sm:$0xff]  ;;  %v473_v23 = vsel %vm90_vm6, %v463_v60, %v1784_v28 }
 0x27d   :  { %v675_v34 = vsel %vm204_vm1, %v576_v30, 0  ;;  %v506_v40 = vsel %vm126_vm4, %v495_v33, %v1758_v5  ;;  %662 = vperm.xlu1 %1299, %v659_v22  }
 0x27e   :  { %712 = vmatpush.bf16.msra.mxu3 %v675_v34  ;;  %v620_v43 = vsel %vm204_vm1, %v506_v40, %v523_v42 }
 0x283   :  { %v1788_v18 = vpop.permute.xlu0 %534  ;;  %v571_v35 = vpop.permute.xlu2 %570 }
 0x284   :  { %v577_v36 = vsel %vm198_vm0, %v569_v27, %v571_v35  ;;  %v548_v37 = vpop.permute.xlu1 %547  ;;  %v542_v45 = vsel %vm162_vm3, %v533_v26, %v1788_v18 }
 0x285   :  { %v678_v17 = vsel %vm204_vm1, %v577_v36, 0  ;;  %v557_v39 = vsel %vm180_vm2, %v546_v14, %v548_v37 }
 0x286   :  { %v640_v31 = vsel %vm204_vm1, %v540_v38, %v557_v39  ;;  %725 = vmatpush.bf16.msra.mxu0 %v678_v17 }
 0x287   :  { %687 = vmatpush.bf16.msrb.mxu1 %v640_v31 }
 0x28b   :  { %688 = vmatpush.bf16.msrb.mxu1 %v620_v43  ;;  %v499_v44 = vpop.permute.xlu0 %498  ;;  %v1800_v46 = vpop.permute.xlu2 %536 }
 0x28c   :  { %v480_v47 = vpop.permute.xlu1 %479  ;;  %v507_v8 = vsel %vm126_vm4, %v1758_v5, %v499_v44 }
 0x293   :  { %v1802_v48 = vpop.permute.xlu0 %466  ;;  %v550_v4 = vpop.permute.xlu2 %549 }
 0x294   :  { %v558_v50 = vsel %vm180_vm2, %v548_v37, %v550_v4  ;;  %v478_v51 = vpop.permute.xlu1 %477  ;;  %v474_v60 = vsel %vm90_vm6, %v1784_v28, %v1802_v48 }
 0x295   :  { %v489_v52 = vsel %vm108_vm7, %v478_v51, %v480_v47  ;;  %v644_v41 = vsel %vm204_vm1, %v541_v49, %v558_v50 }
 0x296   :  { %v600_v54 = vsel %vm204_vm1, %v472_v32, %v489_v52  ;;  %700 = vmatpush.bf16.msra.mxu2 %v644_v41 }
 0x297   :  { %689 = vmatpush.bf16.msrb.mxu1 %v600_v54 }
 0x29b   :  { %690 = vmatpush.bf16.msrb.mxu1 %v580_v56  ;;  %v1814_v21 = vpop.permute.xlu0 %502  ;;  %v482_v62 = vpop.permute.xlu2 %481 }
 0x29c   :  { %v573_v58 = vpop.permute.xlu1 %572  ;;  %v490_v16 = vsel %vm108_vm7, %v480_v47, %v482_v62 }
 0x29d   :  { %v578_v12 = vsel %vm198_vm0, %v571_v35, %v573_v58  ;;  %v604_v13 = vsel %vm204_vm1, %v473_v23, %v490_v16  ;;  %v1384_v16 = vmov 0.0  }
 0x29e   :  { %v681_v11 = vsel %vm204_vm1, %v578_v12, 0  ;;  %1199 = vmatmul.msk.bf16.vlgmr.msrb.gmra.mxu1 %vm292_vm9, %v1821_v59 }
 0x29f   :  { %738 = vmatpush.bf16.msra.mxu1 %v681_v11 }
 0x2a3   :  { %v552_v63 = vpop.permute.xlu0 %551  ;;  %v450_v5 = vpop.permute.xlu2 %449 }
 0x2a4   :  { %v559_v0 = vsel %vm180_vm2, %v550_v4, %v552_v63  ;;  %v539_v29 = vpop.permute.xlu1 %538 }
 0x2a5   :  { %v648_v53 = vsel %vm204_vm1, %v542_v45, %v559_v0  ;;  %v544_v17 = vsel %vm162_vm3, %v1800_v46, %v539_v29 }
 0x2a6   :  { %713 = vmatpush.bf16.msra.mxu3 %v648_v53 }
 0x2ab   :  { %v516_v61 = vpop.permute.xlu0 %515  ;;  %v505_v33 = vpop.permute.xlu2 %504 }
 0x2ac   :  { %v524_v9 = vsel %vm144_vm5, %v1768_v6, %v516_v61  ;;  %v501_v10 = vpop.permute.xlu1 %500 }
 0x2ad   :  { %v624_v14 = vsel %vm204_vm1, %v507_v8, %v524_v9  ;;  %v508_v7 = vsel %vm126_vm4, %v499_v44, %v501_v10 }
 0x2ae   :  { %701 = vmatpush.bf16.msra.mxu2 %v624_v14 }
 0x2b2   :  { %702 = vmatpush.bf16.msra.mxu2 %v604_v13 }
 0x2b3   :  { %v484_v19 = vpop.permute.xlu0 %483  ;;  %v486_v42 = vpop.permute.xlu2 %485 }
 0x2b4   :  { %v518_v6 = vpop.permute.xlu1 %517  ;;  %v491_v26 = vsel %vm108_vm7, %v482_v62, %v484_v19  ;;  %v492_v32 = vsel %vm108_vm7, %v484_v19, %v486_v42 }
 0x2b5   :  { %v525_v24 = vsel %vm144_vm5, %v516_v61, %v518_v6  ;;  %v608_v27 = vsel %vm204_vm1, %v474_v60, %v491_v26 }
 0x2b6   :  { %v628_v25 = vsel %vm204_vm1, %v508_v7, %v525_v24 }
 0x2b7   :  { %714 = vmatpush.bf16.msra.mxu3 %v628_v25 }
 0x2bb   :  { %715 = vmatpush.bf16.msra.mxu3 %v608_v27  ;;  %v522_v30 = vpop.permute.xlu0 %521  ;;  %v452_v51 = vpop.permute.xlu2 %451 }
 0x2bc   :  { %v448_v34 = vpop.permute.xlu1 %447  ;;  %v458_v41 = vsel %vm72_vm8, %v450_v5, %v452_v51 }
 0x2bd   :  { %v456_v35 = vsel %vm72_vm8, %v1778_v20, %v448_v34  ;;  %v457_v36 = vsel %vm72_vm8, %v448_v34, %v450_v5  ;;  %v543_v20 = vsel %vm162_vm3, %v1788_v18, %v1800_v46  ;;  %v510_v18 = vsel %vm126_vm4, %v1814_v21, %v505_v33 }
 0x2be   :  { %v584_v37 = vsel %vm204_vm1, %v1684_v57, %v456_v35  ;;  %v588_v38 = vsel %vm204_vm1, %v1720_v2, %v457_v36  ;;  %v509_v46 = vsel %vm126_vm4, %v501_v10, %v1814_v21  ;;  %v592_v58 = vsel %vm204_vm1, %v1712_v1, %v458_v41 }
 0x2bf   :  { %703 = vmatpush.bf16.msra.mxu2 %v584_v37  ;;  %716 = vmatpush.bf16.msra.mxu3 %v588_v38  ;;  %v823_v36 = vlaneseq  ;;  %v1920_v38 = vld [vmem:[%s2170_s6] ss:$0 sm:$0xff]  ;;  %s1386_s6 = smov [#allocation5]  }
 0x2c0   :  { %s1182_s21 = sshll.u32 %s1386_s6, 4  ;;  %s1183_s21 = int_to_ptr.vmem [resolvable:$true] %s1182_s21 }
 0x2c2   :  { %1200 = vmatmul.msk.bf16.vlgmr.msra.gmra.mxu2 %vm292_vm9, %v1821_v59  ;;  %1201 = vmatmul.msk.bf16.vlgmr.msra.gmra.mxu3 %vm292_vm9, %v1821_v59 }
 0x2c3   :  { %v554_v28 = vpop.permute.xlu0 %553 }
 0x2c4   :  { %v560_v57 = vsel %vm180_vm2, %v552_v63, %v554_v28  ;;  %v561_v2 = vsel %vm180_vm2, %v554_v28, %v1776_v15  ;;  %v469_v39 = vpop.permute.xlu1 %468 }
 0x2c5   :  { %v652_v31 = vsel %vm204_vm1, %v543_v20, %v560_v57  ;;  %v656_v40 = vsel %vm204_vm1, %v544_v17, %v561_v2  ;;  %v475_v50 = vsel %vm90_vm6, %v1802_v48, %v469_v39  ;;  %v1926_v17 = vshrl.u32 %v823_v36, 7 }
 0x2c6   :  { %726 = vmatpush.bf16.msra.mxu0 %v652_v31  ;;  %739 = vmatpush.bf16.msra.mxu1 %v656_v40  ;;  %v612_v52 = vsel %vm204_vm1, %v475_v50, %v492_v32 }
 0x2c7   :  { %v838_v2 = vadd.s32 112, %v1926_v17  ;;  %v836_v31 = vadd.s32 96, %v1926_v17  ;;  %v837_v40 = vadd.s32 104, %v1926_v17  ;;  %v826_v50 = vadd.s32 16, %v1926_v17 }
 0x2c8   :  { %v897_v36 = vadd.s32 584, %v1926_v17 }
 0x2c9   :  { %vm920_vm11 = vcmp.eq.s32.totalorder %v838_v2, %v1920_v38  ;;  %vm918_vm13 = vcmp.eq.s32.totalorder %v836_v31, %v1920_v38  ;;  %vm919_vm15 = vcmp.eq.s32.totalorder %v837_v40, %v1920_v38  ;;  %v862_v2 = vadd.s32 304, %v1926_v17 }
 0x2ca   :  { %vm1206_vm0 = vmpackc.low %vm919_vm15, %vm918_vm13  ;;  %vm908_vm15 = vcmp.eq.s32.totalorder %v826_v50, %v1920_v38  ;;  %v878_v31 = vadd.s32 432, %v1926_v17  ;;  %v879_v40 = vadd.s32 440, %v1926_v17  ;;  %v892_v50 = vadd.s32 544, %v1926_v17 }
 0x2cb   :  { %v471_v43 = vpop.permute.xlu0 %470 }
 0x2cc   :  { %v520_v44 = vpop.permute.xlu1 %519  ;;  %v476_v56 = vsel %vm90_vm6, %v469_v39, %v471_v43  ;;  %v839_v39 = vadd.s32 120, %v1926_v17  ;;  %v835_v43 = vadd.s32 88, %v1926_v17 }
 0x2cd   :  { %v526_v47 = vsel %vm144_vm5, %v518_v6, %v520_v44  ;;  %v527_v15 = vsel %vm144_vm5, %v520_v44, %v522_v30  ;;  %v1385_v44 = vmov 1.0|1.0  }
 0x2ce   :  { %v632_v4 = vsel %vm204_vm1, %v509_v46, %v526_v47  ;;  %v636_v49 = vsel %vm204_vm1, %v510_v18, %v527_v15  ;;  %vm921_vm12 = vcmp.eq.s32.totalorder %v839_v39, %v1920_v38  ;;  %vm917_vm2 = vcmp.eq.s32.totalorder %v835_v43, %v1920_v38 }
 0x2cf   :  { %727 = vmatpush.bf16.msra.mxu0 %v632_v4  ;;  %740 = vmatpush.bf16.msra.mxu1 %v636_v49  ;;  %vm1204_vm14 = vmpackc.low %vm921_vm12, %vm920_vm11  ;;  %v832_v18 = vadd.s32 64, %v1926_v17  ;;  %v833_v46 = vadd.s32 72, %v1926_v17  ;;  %v830_v47 = vadd.s32 48, %v1926_v17  ;;  %v831_v15 = vadd.s32 56, %v1926_v17 }
 0x2d0   :  { %1205 = vmatpush.bf16.msk.msrb.mxu2 %vm1204_vm14, %v1385_v44  ;;  %v828_v4 = vadd.s32 32, %v1926_v17  ;;  %v829_v49 = vadd.s32 40, %v1926_v17  ;;  %v863_v39 = vadd.s32 312, %v1926_v17  ;;  %v895_v43 = vadd.s32 568, %v1926_v17 }
 0x2d1   :  { %vm914_vm4 = vcmp.eq.s32.totalorder %v832_v18, %v1920_v38  ;;  %vm915_vm5 = vcmp.eq.s32.totalorder %v833_v46, %v1920_v38  ;;  %vm913_vm10 = vcmp.eq.s32.totalorder %v831_v15, %v1920_v38  ;;  %v844_v18 = vadd.s32 160, %v1926_v17 }
 0x2d2   :  { %vm1210_vm6 = vmpackc.low %vm915_vm5, %vm914_vm4  ;;  %vm910_vm12 = vcmp.eq.s32.totalorder %v828_v4, %v1920_v38  ;;  %vm911_vm13 = vcmp.eq.s32.totalorder %v829_v49, %v1920_v38  ;;  %v845_v46 = vadd.s32 168, %v1926_v17  ;;  %v861_v15 = vadd.s32 296, %v1926_v17 }
 0x2d3   :  { %728 = vmatpush.bf16.msra.mxu0 %v612_v52  ;;  %v454_v54 = vpop.permute.xlu0 %453  ;;  %vm1214_vm14 = vmpackc.low %vm911_vm13, %vm910_vm12  ;;  %v876_v4 = vadd.s32 416, %v1926_v17  ;;  %v877_v49 = vadd.s32 424, %v1926_v17 }
 0x2d4   :  { %v488_v55 = vpop.permute.xlu1 %487  ;;  %v459_v12 = vsel %vm72_vm8, %v452_v51, %v454_v54  ;;  %1207 = vmatpush.bf16.msk.msrb.mxu2 %vm1206_vm0, %v1385_v44  ;;  %v827_v51 = vadd.s32 24, %v1926_v17 }
 0x2d5   :  { %v493_v21 = vsel %vm108_vm7, %v486_v42, %v488_v55  ;;  %v596_v11 = vsel %vm204_vm1, %v1738_v3, %v459_v12  ;;  %v834_v42 = vadd.s32 80, %v1926_v17 }
 0x2d6   :  { %v616_v48 = vsel %vm204_vm1, %v476_v56, %v493_v21  ;;  %vm909_vm0 = vcmp.eq.s32.totalorder %v827_v51, %v1920_v38  ;;  %v893_v51 = vadd.s32 552, %v1926_v17 }
 0x2d7   :  { %729 = vmatpush.bf16.msra.mxu0 %v592_v58  ;;  %741 = vmatpush.bf16.msra.mxu1 %v616_v48  ;;  %vm916_vm1 = vcmp.eq.s32.totalorder %v834_v42, %v1920_v38  ;;  %v894_v42 = vadd.s32 560, %v1926_v17 }
 0x2d8   :  { %vm1208_vm3 = vmpackc.low %vm917_vm2, %vm916_vm1 }
 0x2d9   :  { %1209 = vmatpush.bf16.msk.msrb.mxu2 %vm1208_vm3, %v1385_v44  ;;  %vm1216_vm1 = vmpackc.low %vm909_vm0, %vm908_vm15 }
 0x2da   :  { %1202 = vmatmul.msk.bf16.vlgmr.msra.gmra.mxu0 %vm292_vm9, %v1821_v59 }
 0x2db   :  { %742 = vmatpush.bf16.msra.mxu1 %v596_v11  ;;  %v825_v11 = vadd.s32 8, %v1926_v17 }
 0x2dd   :  { %1211 = vmatpush.bf16.msk.msrb.mxu2 %vm1210_vm6, %v1385_v44  ;;  %vm907_vm2 = vcmp.eq.s32.totalorder %v825_v11, %v1920_v38  ;;  %v891_v11 = vadd.s32 536, %v1926_v17 }
 0x2de   :  { %1203 = vmatmul.msk.bf16.vlgmr.msra.gmra.mxu1 %vm292_vm9, %v1821_v59  ;;  %vm912_vm9 = vcmp.eq.s32.totalorder %v830_v47, %v1920_v38  ;;  %v860_v47 = vadd.s32 288, %v1926_v17 }
 0x2df   :  { %vm1212_vm11 = vmpackc.low %vm913_vm10, %vm912_vm9 }
 0x2e1   :  { %1213 = vmatpush.bf16.msk.msrb.mxu2 %vm1212_vm11, %v1385_v44 }
 0x2e5   :  { %1215 = vmatpush.bf16.msk.msrb.mxu2 %vm1214_vm14, %v1385_v44 }
 0x2e9   :  { %1217 = vmatpush.bf16.msk.msrb.mxu2 %vm1216_vm1, %v1385_v44 }
 0x2ef   :  { %v663_v0 = vpop.permute.xlu1 %662 }
 0x31b   :  { %v692_v63 = vpop.f32.mrf.mxu1 }
 0x31c   :  { %v693_v1 = vadd.f32 %v692_v63, %v663_v0  ;;  %v854_v63 = vadd.s32 240, %v1926_v17 }
 0x31e   :  { %v748_v8 = vmax.f32 %v693_v1, 0.0  ;;  %v871_v1 = vadd.s32 376, %v1926_v17  ;;  %vm936_vm4 = vcmp.eq.s32.totalorder %v854_v63, %v1920_v38  ;;  %v840_v63 = vadd.s32 128, %v1926_v17 }
 0x320   :  { %vm953_vm9 = vcmp.eq.s32.totalorder %v871_v1, %v1920_v38  ;;  %v857_v1 = vadd.s32 264, %v1926_v17 }
 0x323   :  { %v694_v45 = vpop.f32.mrf.mxu1 }
 0x324   :  { %v855_v45 = vadd.s32 248, %v1926_v17 }
 0x326   :  { %vm937_vm5 = vcmp.eq.s32.totalorder %v855_v45, %v1920_v38  ;;  %v841_v45 = vadd.s32 136, %v1926_v17 }
 0x327   :  { %vm1220_vm10 = vmpackc.low %vm937_vm5, %vm936_vm4 }
 0x328   :  { %1221 = vmatpush.bf16.msk.msrb.mxu3 %vm1220_vm10, %v1385_v44 }
 0x345   :  { %v705_v29 = vpop.f32.mrf.mxu2  ;;  %v718_v53 = vpop.f32.mrf.mxu3 }
 0x346   :  { %v1895_v62 = vadd.f32 %v718_v53, %v663_v0  ;;  %v706_v61 = vadd.f32 %v705_v29, %v663_v0  ;;  %v886_v29 = vadd.s32 496, %v1926_v17  ;;  %v887_v53 = vadd.s32 504, %v1926_v17 }
 0x348   :  { %v750_v9 = vmax.f32 %v1895_v62, 0.0  ;;  %v749_v10 = vmax.f32 %v706_v61, 0.0  ;;  %vm968_vm11 = vcmp.eq.s32.totalorder %v886_v29, %v1920_v38  ;;  %vm969_vm12 = vcmp.eq.s32.totalorder %v887_v53, %v1920_v38 }
 0x349   :  { %v902_v62 = vadd.s32 624, %v1926_v17  ;;  %v903_v61 = vadd.s32 632, %v1926_v17  ;;  %vm1252_vm14 = vmpackc.low %vm969_vm12, %vm968_vm11  ;;  %v872_v29 = vadd.s32 384, %v1926_v17  ;;  %v873_v53 = vadd.s32 392, %v1926_v17 }
 0x34a   :  { %763 = vrot.lane.b32.xlu0 %v750_v9, %s1380_s11  ;;  %v1300_v3 = vpack.i.bf16 %v749_v10, %v748_v8  ;;  %1253 = vmatpush.bf16.msk.msrb.mxu1 %vm1252_vm14, %v1385_v44 }
 0x34b   :  { %vm984_vm15 = vcmp.eq.s32.totalorder %v902_v62, %v1920_v38  ;;  %vm985_vm0 = vcmp.eq.s32.totalorder %v903_v61, %v1920_v38  ;;  %v888_v62 = vadd.s32 512, %v1926_v17  ;;  %v889_v61 = vadd.s32 520, %v1926_v17 }
 0x34c   :  { %1301 = vrot.lane.b32.xlu2 %v1300_v3, %s1380_s11  ;;  %v869_v3 = vadd.s32 360, %v1926_v17  ;;  %vm1268_vm1 = vmpackc.low %vm985_vm0, %vm984_vm15 }
 0x34d   :  { %v720_v59 = vpop.f32.mrf.mxu3  ;;  %v707_v14 = vpop.f32.mrf.mxu2 }
 0x34e   :  { %v884_v59 = vadd.s32 480, %v1926_v17  ;;  %v885_v14 = vadd.s32 488, %v1926_v17  ;;  %vm951_vm4 = vcmp.eq.s32.totalorder %v869_v3, %v1920_v38 }
 0x354   :  { %769 = vrot.lane.b32.xlu2 %v1384_v16, %s1380_s11  ;;  %v900_v16 = vadd.s32 608, %v1926_v17 }
 0x356   :  { %vm982_vm12 = vcmp.eq.s32.totalorder %v900_v16, %v1920_v38 }
 0x357   :  { %v731_v22 = vpop.f32.mrf.mxu0 }
 0x358   :  { %v1903_v23 = vadd.f32 %v731_v22, %v663_v0  ;;  %v901_v22 = vadd.s32 616, %v1926_v17 }
 0x35a   :  { %v751_v19 = vmax.f32 %v1903_v23, 0.0  ;;  %v850_v23 = vadd.s32 208, %v1926_v17 }
 0x35b   :  { %v744_v13 = vpop.f32.mrf.mxu1 }
 0x35c   :  { %v1905_v5 = vadd.f32 %v744_v13, %v663_v0  ;;  %v870_v0 = vadd.s32 368, %v1926_v17  ;;  %v851_v13 = vadd.s32 216, %v1926_v17  ;;  %vm932_vm15 = vcmp.eq.s32.totalorder %v850_v23, %v1920_v38 }
 0x35e   :  { %v752_v6 = vmax.f32 %v1905_v5, 0.0  ;;  %vm952_vm6 = vcmp.eq.s32.totalorder %v870_v0, %v1920_v38  ;;  %v866_v5 = vadd.s32 336, %v1926_v17  ;;  %vm933_vm0 = vcmp.eq.s32.totalorder %v851_v13, %v1920_v38 }
 0x35f   :  { %v733_v7 = vpop.f32.mrf.mxu0  ;;  %vm1236_vm13 = vmpackc.low %vm953_vm9, %vm952_vm6  ;;  %vm966_vm6 = vcmp.eq.s32.totalorder %v884_v59, %v1920_v38  ;;  %vm967_vm9 = vcmp.eq.s32.totalorder %v885_v14, %v1920_v38  ;;  %v856_v0 = vadd.s32 256, %v1926_v17 }
 0x360   :  { %v1305_v24 = vpack.i.bf16 %v752_v6, %v751_v19  ;;  %1237 = vmatpush.bf16.msk.msrb.mxu0 %vm1236_vm13, %v1385_v44  ;;  %vm1254_vm11 = vmpackc.low %vm967_vm9, %vm966_vm6  ;;  %vm983_vm13 = vcmp.eq.s32.totalorder %v901_v22, %v1920_v38  ;;  %v883_v7 = vadd.s32 472, %v1926_v17 }
 0x361   :  { %1255 = vmatpush.bf16.msk.msrb.mxu1 %vm1254_vm11, %v1385_v44  ;;  %vm1270_vm14 = vmpackc.low %vm983_vm13, %vm982_vm12 }
 0x362   :  { %1306 = vrot.lane.b32.xlu1 %v1305_v24, %s1380_s11  ;;  %v898_v24 = vadd.s32 592, %v1926_v17 }
 0x363   :  { %v746_v25 = vpop.f32.mrf.mxu1 }
 0x364   :  { %v899_v25 = vadd.s32 600, %v1926_v17  ;;  %vm980_vm9 = vcmp.eq.s32.totalorder %v898_v24, %v1920_v38 }
 0x3a6   :  { %v1302_v26 = vpop.permute.xlu2 %1301 }
 0x3a7   :  { %v1304_v27 = vunpack.i.h.bf16 %v1302_v26  ;;  %v1303_v30 = vunpack.i.l.bf16 %v1302_v26  ;;  %v848_v26 = vadd.s32 192, %v1926_v17 }
 0x3a9   :  { %v772_v34 = vsel %vm72_vm8, %v1303_v30, %v1304_v27  ;;  %v865_v30 = vadd.s32 328, %v1926_v17  ;;  %vm930_vm12 = vcmp.eq.s32.totalorder %v848_v26, %v1920_v38 }
 0x3aa   :  { %v1924_v20 = vmax.f32 %v748_v8, %v772_v34  ;;  %v852_v8 = vadd.s32 224, %v1926_v17  ;;  %v881_v34 = vadd.s32 456, %v1926_v17 }
 0x3ae   :  { %v770_v60 = vpop.permute.xlu2 %769 }
 0x3af   :  { %v788_v33 = vmax.f32 %v770_v60, 0.0 }
 0x3b1   :  { %805 = vrot.lane.b32.xlu2 %v788_v33, %s1381_s12  ;;  %v880_v33 = vadd.s32 448, %v1926_v17 }
 0x3bc   :  { %v764_v35 = vpop.permute.xlu0 %763 }
 0x3bd   :  { %v773_v37 = vsel %vm72_vm8, %v1304_v27, %v764_v35  ;;  %v864_v27 = vadd.s32 320, %v1926_v17 }
 0x3be   :  { %v1922_v28 = vmax.f32 %v749_v10, %v773_v37  ;;  %v868_v10 = vadd.s32 352, %v1926_v17  ;;  %v846_v37 = vadd.s32 176, %v1926_v17 }
 0x3c0   :  { %v1310_v57 = vpack.i.bf16 %v1922_v28, %v1924_v20 }
 0x3c2   :  { %1311 = vrot.lane.b32.xlu0 %v1310_v57, %s1381_s12  ;;  %v847_v57 = vadd.s32 184, %v1926_v17 }
 0x3d4   :  { %v1307_v32 = vpop.permute.xlu1 %1306 }
 0x3d5   :  { %v1309_v52 = vunpack.i.h.bf16 %v1307_v32  ;;  %v1308_v41 = vunpack.i.l.bf16 %v1307_v32  ;;  %v842_v32 = vadd.s32 144, %v1926_v17 }
 0x3d7   :  { %v774_v54 = vsel %vm72_vm8, %v764_v35, %v1308_v41  ;;  %v776_v55 = vsel %vm72_vm8, %v1309_v52, %v770_v60  ;;  %v775_v56 = vsel %vm72_vm8, %v1308_v41, %v1309_v52  ;;  %vm906_vm8 = vcmp.eq.s32.totalorder %v1926_v17, %v1920_v38 }
 0x3d8   :  { %v1969_v21 = vmax.f32 %v752_v6, %v776_v55  ;;  %v1973_v58 = vmax.f32 %v751_v19, %v775_v56  ;;  %v1977_v48 = vmax.f32 %v750_v9, %v774_v54  ;;  %vm1218_vm3 = vmpackc.low %vm907_vm2, %vm906_vm8  ;;  %v853_v9 = vadd.s32 232, %v1926_v17 }
 0x3d9   :  { %1219 = vmatpush.bf16.msk.msrb.mxu2 %vm1218_vm3, %v1385_v44  ;;  %vm934_vm8 = vcmp.eq.s32.totalorder %v852_v8, %v1920_v38  ;;  %vm950_vm3 = vcmp.eq.s32.totalorder %v868_v10, %v1920_v38  ;;  %v867_v19 = vadd.s32 344, %v1926_v17  ;;  %v882_v6 = vadd.s32 464, %v1926_v17 }
 0x3da   :  { %801 = vrot.lane.b32.xlu0 %v1973_v58, %s1381_s12  ;;  %v1315_v12 = vpack.i.bf16 %v1969_v21, %v1977_v48  ;;  %vm935_vm2 = vcmp.eq.s32.totalorder %v853_v9, %v1920_v38  ;;  %vm1238_vm10 = vmpackc.low %vm951_vm4, %vm950_vm3  ;;  %vm965_vm4 = vcmp.eq.s32.totalorder %v883_v7, %v1920_v38  ;;  %v849_v60 = vadd.s32 200, %v1926_v17 }
 0x3db   :  { %vm1222_vm5 = vmpackc.low %vm935_vm2, %vm934_vm8  ;;  %1239 = vmatpush.bf16.msk.msrb.mxu0 %vm1238_vm10, %v1385_v44  ;;  %vm949_vm8 = vcmp.eq.s32.totalorder %v867_v19, %v1920_v38  ;;  %vm964_vm3 = vcmp.eq.s32.totalorder %v882_v6, %v1920_v38  ;;  %vm981_vm10 = vcmp.eq.s32.totalorder %v899_v25, %v1920_v38  ;;  %v896_v35 = vadd.s32 576, %v1926_v17 }
 0x3dc   :  { %1316 = vrot.lane.b32.xlu1 %v1315_v12, %s1381_s12  ;;  %1223 = vmatpush.bf16.msk.msrb.mxu3 %vm1222_vm5, %v1385_v44  ;;  %vm1224_vm2 = vmpackc.low %vm933_vm0, %vm932_vm15  ;;  %vm931_vm13 = vcmp.eq.s32.totalorder %v849_v60, %v1920_v38  ;;  %vm947_vm15 = vcmp.eq.s32.totalorder %v865_v30, %v1920_v38  ;;  %v843_v52 = vadd.s32 152, %v1926_v17  ;;  %v858_v41 = vadd.s32 272, %v1926_v17 }
 0x3dd   :  { %1269 = vmatpush.bf16.msk.msra.mxu2 %vm1268_vm1, %v1385_v44  ;;  %vm948_vm1 = vcmp.eq.s32.totalorder %v866_v5, %v1920_v38  ;;  %vm1256_vm6 = vmpackc.low %vm965_vm4, %vm964_vm3  ;;  %vm978_vm4 = vcmp.eq.s32.totalorder %v896_v35, %v1920_v38  ;;  %v859_v54 = vadd.s32 280, %v1926_v17  ;;  %v874_v55 = vadd.s32 400, %v1926_v17 }
 0x3de   :  { %vm1240_vm5 = vmpackc.low %vm949_vm8, %vm948_vm1  ;;  %1257 = vmatpush.bf16.msk.msrb.mxu1 %vm1256_vm6, %v1385_v44  ;;  %vm962_vm1 = vcmp.eq.s32.totalorder %v880_v33, %v1920_v38  ;;  %vm963_vm8 = vcmp.eq.s32.totalorder %v881_v34, %v1920_v38  ;;  %v875_v56 = vadd.s32 408, %v1926_v17  ;;  %v890_v12 = vadd.s32 528, %v1926_v17 }
 0x3df   :  { %1241 = vmatpush.bf16.msk.msrb.mxu0 %vm1240_vm5, %v1385_v44  ;;  %vm1272_vm11 = vmpackc.low %vm981_vm10, %vm980_vm9  ;;  %vm979_vm5 = vcmp.eq.s32.totalorder %v897_v36, %v1920_v38  ;;  %vm928_vm9 = vcmp.eq.s32.totalorder %v846_v37, %v1920_v38  ;;  %vm929_vm10 = vcmp.eq.s32.totalorder %v847_v57, %v1920_v38 }
 0x3e0   :  { %1225 = vmatpush.bf16.msk.msrb.mxu3 %vm1224_vm2, %v1385_v44  ;;  %vm1226_vm0 = vmpackc.low %vm931_vm13, %vm930_vm12  ;;  %vm945_vm12 = vcmp.eq.s32.totalorder %v863_v39, %v1920_v38 }
 0x3e1   :  { %1271 = vmatpush.bf16.msk.msra.mxu2 %vm1270_vm14, %v1385_v44  ;;  %vm946_vm14 = vcmp.eq.s32.totalorder %v864_v27, %v1920_v38  ;;  %vm1258_vm3 = vmpackc.low %vm963_vm8, %vm962_vm1  ;;  %vm976_vm8 = vcmp.eq.s32.totalorder %v894_v42, %v1920_v38 }
 0x3e2   :  { %vm1242_vm2 = vmpackc.low %vm947_vm15, %vm946_vm14  ;;  %1259 = vmatpush.bf16.msk.msrb.mxu1 %vm1258_vm3, %v1385_v44  ;;  %vm960_vm14 = vcmp.eq.s32.totalorder %v878_v31, %v1920_v38  ;;  %vm961_vm15 = vcmp.eq.s32.totalorder %v879_v40, %v1920_v38 }
 0x3e3   :  { %1243 = vmatpush.bf16.msk.msrb.mxu0 %vm1242_vm2, %v1385_v44  ;;  %vm1274_vm6 = vmpackc.low %vm979_vm5, %vm978_vm4  ;;  %vm977_vm2 = vcmp.eq.s32.totalorder %v895_v43, %v1920_v38  ;;  %vm926_vm4 = vcmp.eq.s32.totalorder %v844_v18, %v1920_v38  ;;  %vm927_vm5 = vcmp.eq.s32.totalorder %v845_v46, %v1920_v38 }
 0x3e4   :  { %1227 = vmatpush.bf16.msk.msrb.mxu3 %vm1226_vm0, %v1385_v44  ;;  %vm1228_vm13 = vmpackc.low %vm929_vm10, %vm928_vm9  ;;  %vm943_vm9 = vcmp.eq.s32.totalorder %v861_v15, %v1920_v38 }
 0x3e5   :  { %1273 = vmatpush.bf16.msk.msra.mxu2 %vm1272_vm11, %v1385_v44  ;;  %vm944_vm11 = vcmp.eq.s32.totalorder %v862_v2, %v1920_v38  ;;  %vm1260_vm1 = vmpackc.low %vm961_vm15, %vm960_vm14  ;;  %vm974_vm15 = vcmp.eq.s32.totalorder %v892_v50, %v1920_v38 }
 0x3e6   :  { %vm1244_vm0 = vmpackc.low %vm945_vm12, %vm944_vm11  ;;  %1261 = vmatpush.bf16.msk.msrb.mxu1 %vm1260_vm1, %v1385_v44  ;;  %vm958_vm11 = vcmp.eq.s32.totalorder %v876_v4, %v1920_v38  ;;  %vm959_vm12 = vcmp.eq.s32.totalorder %v877_v49, %v1920_v38 }
 0x3e7   :  { %1245 = vmatpush.bf16.msk.msrb.mxu0 %vm1244_vm0, %v1385_v44  ;;  %vm1276_vm3 = vmpackc.low %vm977_vm2, %vm976_vm8  ;;  %vm975_vm0 = vcmp.eq.s32.totalorder %v893_v51, %v1920_v38  ;;  %vm924_vm8 = vcmp.eq.s32.totalorder %v842_v32, %v1920_v38  ;;  %vm925_vm2 = vcmp.eq.s32.totalorder %v843_v52, %v1920_v38 }
 0x3e8   :  { %1229 = vmatpush.bf16.msk.msrb.mxu3 %vm1228_vm13, %v1385_v44  ;;  %vm1230_vm10 = vmpackc.low %vm927_vm5, %vm926_vm4  ;;  %vm941_vm4 = vcmp.eq.s32.totalorder %v859_v54, %v1920_v38 }
 0x3e9   :  { %1275 = vmatpush.bf16.msk.msra.mxu2 %vm1274_vm6, %v1385_v44  ;;  %vm942_vm6 = vcmp.eq.s32.totalorder %v860_v47, %v1920_v38  ;;  %vm1262_vm14 = vmpackc.low %vm959_vm12, %vm958_vm11  ;;  %vm972_vm12 = vcmp.eq.s32.totalorder %v890_v12, %v1920_v38 }
 0x3ea   :  { %vm1246_vm13 = vmpackc.low %vm943_vm9, %vm942_vm6  ;;  %1263 = vmatpush.bf16.msk.msrb.mxu1 %vm1262_vm14, %v1385_v44  ;;  %vm956_vm6 = vcmp.eq.s32.totalorder %v874_v55, %v1920_v38  ;;  %vm957_vm9 = vcmp.eq.s32.totalorder %v875_v56, %v1920_v38 }
 0x3eb   :  { %1247 = vmatpush.bf16.msk.msrb.mxu0 %vm1246_vm13, %v1385_v44  ;;  %vm1278_vm1 = vmpackc.low %vm975_vm0, %vm974_vm15  ;;  %vm973_vm13 = vcmp.eq.s32.totalorder %v891_v11, %v1920_v38  ;;  %vm922_vm15 = vcmp.eq.s32.totalorder %v840_v63, %v1920_v38  ;;  %vm923_vm0 = vcmp.eq.s32.totalorder %v841_v45, %v1920_v38 }
 0x3ec   :  { %1231 = vmatpush.bf16.msk.msrb.mxu3 %vm1230_vm10, %v1385_v44  ;;  %vm1232_vm5 = vmpackc.low %vm925_vm2, %vm924_vm8  ;;  %vm939_vm8 = vcmp.eq.s32.totalorder %v857_v1, %v1920_v38 }
 0x3ed   :  { %1277 = vmatpush.bf16.msk.msra.mxu2 %vm1276_vm3, %v1385_v44  ;;  %vm940_vm3 = vcmp.eq.s32.totalorder %v858_v41, %v1920_v38  ;;  %vm1264_vm11 = vmpackc.low %vm957_vm9, %vm956_vm6  ;;  %vm970_vm9 = vcmp.eq.s32.totalorder %v888_v62, %v1920_v38 }
 0x3ee   :  { %vm1248_vm10 = vmpackc.low %vm941_vm4, %vm940_vm3  ;;  %1265 = vmatpush.bf16.msk.msrb.mxu1 %vm1264_vm11, %v1385_v44  ;;  %vm954_vm3 = vcmp.eq.s32.totalorder %v872_v29, %v1920_v38  ;;  %vm955_vm4 = vcmp.eq.s32.totalorder %v873_v53, %v1920_v38 }
 0x3ef   :  { %1249 = vmatpush.bf16.msk.msrb.mxu0 %vm1248_vm10, %v1385_v44  ;;  %vm1280_vm14 = vmpackc.low %vm973_vm13, %vm972_vm12  ;;  %vm971_vm10 = vcmp.eq.s32.totalorder %v889_v61, %v1920_v38 }
 0x3f0   :  { %1233 = vmatpush.bf16.msk.msrb.mxu3 %vm1232_vm5, %v1385_v44  ;;  %vm1234_vm2 = vmpackc.low %vm923_vm0, %vm922_vm15 }
 0x3f1   :  { %1279 = vmatpush.bf16.msk.msra.mxu2 %vm1278_vm1, %v1385_v44  ;;  %vm938_vm1 = vcmp.eq.s32.totalorder %v856_v0, %v1920_v38  ;;  %vm1266_vm6 = vmpackc.low %vm955_vm4, %vm954_vm3 }
 0x3f2   :  { %vm1250_vm5 = vmpackc.low %vm939_vm8, %vm938_vm1  ;;  %1267 = vmatpush.bf16.msk.msrb.mxu1 %vm1266_vm6, %v1385_v44 }
 0x3f3   :  { %1251 = vmatpush.bf16.msk.msrb.mxu0 %vm1250_vm5, %v1385_v44  ;;  %vm1282_vm11 = vmpackc.low %vm971_vm10, %vm970_vm9 }
 0x3f4   :  { %1235 = vmatpush.bf16.msk.msrb.mxu3 %vm1234_vm2, %v1385_v44 }
 0x3f5   :  { %1281 = vmatpush.bf16.msk.msra.mxu2 %vm1280_vm14, %v1385_v44 }
 0x3f9   :  { %1283 = vmatpush.bf16.msk.msra.mxu2 %vm1282_vm11, %v1385_v44 }
 0x40b   :  { %v806_v23 = vpop.permute.xlu2 %805 }
 0x434   :  { %v1312_v8 = vpop.permute.xlu0 %1311 }
 0x435   :  { %v1314_v9 = vunpack.i.h.bf16 %v1312_v8  ;;  %v1313_v10 = vunpack.i.l.bf16 %v1312_v8 }
 0x437   :  { %v808_v17 = vsel %vm108_vm7, %v1313_v10, %v1314_v9 }
 0x438   :  { %v818_v3 = vmax.f32 %v1924_v20, %v808_v17 }
 0x43a   :  { %v1106_v59 = vpack.c.bf16 %v818_v3, %v818_v3 }
 0x43c   :  { %1119 = vmatmul.bf16.vlgmr.msrb.gmra.mxu2 %v1106_v59 }
 0x44c   :  { %v802_v13 = vpop.permute.xlu0 %801 }
 0x44e   :  { %v1317_v14 = vpop.permute.xlu1 %1316 }
 0x44f   :  { %v1319_v16 = vunpack.i.h.bf16 %v1317_v14  ;;  %v1318_v22 = vunpack.i.l.bf16 %v1317_v14 }
 0x451   :  { %v812_v38 = vsel %vm108_vm7, %v1319_v16, %v806_v23  ;;  %v809_v5 = vsel %vm108_vm7, %v1314_v9, %v1318_v22  ;;  %v810_v19 = vsel %vm108_vm7, %v1318_v22, %v802_v13  ;;  %v811_v6 = vsel %vm108_vm7, %v802_v13, %v1319_v16 }
 0x452   :  { %v822_v44 = vmax.f32 %v1969_v21, %v812_v38  ;;  %v819_v7 = vmax.f32 %v1922_v28, %v809_v5  ;;  %v820_v20 = vmax.f32 %v1977_v48, %v810_v19  ;;  %v821_v24 = vmax.f32 %v1973_v58, %v811_v6 }
 0x454   :  { %v1110_v25 = vpack.c.bf16 %v822_v44, %v822_v44  ;;  %v1107_v26 = vpack.c.bf16 %v819_v7, %v819_v7  ;;  %v1108_v60 = vpack.c.bf16 %v820_v20, %v820_v20  ;;  %v1109_v27 = vpack.c.bf16 %v821_v24, %v821_v24 }
 0x456   :  { %1132 = vmatmul.bf16.vlgmr.msrb.gmra.mxu3 %v1107_v26  ;;  %1145 = vmatmul.bf16.vlgmr.msrb.gmra.mxu0 %v1108_v60 }
 0x457   :  { %1158 = vmatmul.bf16.vlgmr.msrb.gmra.mxu1 %v1109_v27  ;;  %1171 = vmatmul.bf16.vlgmr.msra.gmra.mxu2 %v1110_v25 }
 0x4bf   :  { %v1120_v30 = vpop.f32.mrf.mxu2 }
 0x4c7   :  { %v1122_v33 = vpop.f32.mrf.mxu2 }
 0x4d3   :  { %v1146_v34 = vpop.f32.mrf.mxu0 }
 0x4d4   :  { %v1159_v35 = vpop.f32.mrf.mxu1 }
 0x4d9   :  { %v1133_v36 = vpop.f32.mrf.mxu3 }
 0x4da   :  { %v1134_v21 = vadd.f32 %v1133_v36, %v1120_v30  ;;  %v1172_v37 = vpop.f32.mrf.mxu2 }
 0x4db   :  { %v1148_v28 = vpop.f32.mrf.mxu0 }
 0x4dc   :  { %v1147_v57 = vadd.f32 %v1146_v34, %v1134_v21  ;;  %v1161_v48 = vpop.f32.mrf.mxu1 }
 0x4de   :  { %v1160_v58 = vadd.f32 %v1159_v35, %v1147_v57 }
 0x4e0   :  { %v1173_v2 = vadd.f32 %v1172_v37, %v1160_v58 }
 0x4e1   :  { %v1135_v39 = vpop.f32.mrf.mxu3 }
 0x4e2   :  { %1176 = vst [vmem:[#allocation5] sm:$0xff] %v1173_v2  ;;  %v1174_v31 = vpop.f32.mrf.mxu2 }
 0x4e3   :  { %1187 = dma.vmem_to_hbm [thread:$0]  %s1183_s21, 128, %s1185_s24, [#allocation4]  }
 0x4e4   :  { %1371 = dma.done.wait [#allocation4], 128  }
 0x4e5   :  { %1372 = vsyncadd [#allocation4], 4294967168 }
 0x4e6   :  { %1192 = vsyncpa [#allocation3], 1 }
 0x4e7   :  { %1193 = vsyncpa [#allocation4], 1 }

</bundles_post_ra>
